<compile_context>
chip_gen: v7x
topology: tpu7x:2x2x1
jax: 0.10.0
libtpu: 0.0.40
codegen_flags: <defaults>
</compile_context>

<pallas_src>
import functools

import jax
import jax.numpy as jnp
from jax import lax
from jax.experimental import pallas as pl
from jax.experimental.pallas import tpu as pltpu


MATMUL_DTYPE = jnp.bfloat16   # MXU input dtype (accumulation stays f32)


# ------------------------------ fused kernel ------------------------------- #

def fused_eqrdqn_kernel(x_ref,                      # (1, H, W, 5)  f32
                        w1_ref, b1_ref,             # (45, 32)  bf16, (1, 32)  f32
                        w2_ref, b2_ref,             # (288, 64) bf16, (1, 64)  f32
                        w3_ref, b3_ref,             # (576,128) bf16, (1, 128) f32
                        wa_ref, ba_ref,             # (2, 128)  bf16, (2, 1)   f32
                        wf1_ref, bf1_ref,           # (2HW, 64) bf16, (1, 64)  f32
                        wf2_ref, bf2_ref,           # (64, N*A) bf16, (1, N*A) f32
                        act_ref,                    # (1, 1, A)    f32 out
                        val_ref,                    # (1, 1, N*A)  f32 out
                        xp_s,                       # (H+2, W+2, 64) f32 scratch
                        patch_s,                    # (H*W, 576) bf16 scratch
                        *, H, W, A, N):
    HW = H * W

    # ---- zero-padded activation scratch (border stays zero all layers) ----
    xp_s[...] = jnp.zeros_like(xp_s)
    xp_s[1:H + 1, 1:W + 1, :5] = x_ref[0]

    def conv3x3_relu(cin, w_ref, b_ref):
        # im2col: pack the 9 shifted windows into one (HW, 9*cin) patch, then
        # a single MXU matmul with K = 9*cin.
        for t in range(9):
            ky, kx = divmod(t, 3)
            win = xp_s[ky:ky + H, kx:kx + W, :cin]            # (H, W, cin) f32
            patch_s[:, t * cin:(t + 1) * cin] = (
                win.reshape(HW, cin).astype(MATMUL_DTYPE))
        y = jnp.dot(patch_s[:, :9 * cin], w_ref[...],
                    preferred_element_type=jnp.float32)        # (HW, cout) f32
        return jnp.maximum(y + b_ref[...], 0.0)

    h = conv3x3_relu(5, w1_ref, b1_ref)                        # (HW, 32)
    xp_s[1:H + 1, 1:W + 1, :32] = h.reshape(H, W, 32)
    h = conv3x3_relu(32, w2_ref, b2_ref)                       # (HW, 64)
    xp_s[1:H + 1, 1:W + 1, :64] = h.reshape(H, W, 64)
    h = conv3x3_relu(64, w3_ref, b3_ref)                       # (HW, 128)

    # ---- 1x1 conv (128 -> 2) + relu, computed transposed: (2, HW) ----------
    # xv_t[c, r] = sum_d wa[d, c] * h[r, d]   (A @ B^T matmul, no transposes)
    xv_t = lax.dot_general(wa_ref[...], h.astype(MATMUL_DTYPE),
                           dimension_numbers=(((1,), (1,)), ((), ())),
                           preferred_element_type=jnp.float32)  # (2, HW)
    xv_t = jnp.maximum(xv_t + ba_ref[...], 0.0).astype(MATMUL_DTYPE)

    # ---- act_fc1: PyTorch flattens NCHW as index c*HW + r, so contract the
    #      two channel row-blocks of the (2*HW, 64) weight separately --------
    hf1 = (jnp.dot(xv_t[0:1, :], wf1_ref[0:HW, :],
                   preferred_element_type=jnp.float32)
           + jnp.dot(xv_t[1:2, :], wf1_ref[HW:2 * HW, :],
                     preferred_element_type=jnp.float32)
           + bf1_ref[...])
    hf1 = jnp.maximum(hf1, 0.0).astype(MATMUL_DTYPE)            # (1, 64)

    # ---- act_fc2 -> quantile logits ----------------------------------------
    logits = (jnp.dot(hf1, wf2_ref[...], preferred_element_type=jnp.float32)
              + bf2_ref[...])                                   # (1, N*A)
    val_ref[0] = logits

    # ---- mean over quantiles (static lane slices) + log_softmax ------------
    m = logits[:, 0:A]
    for n in range(1, N):
        m = m + logits[:, n * A:(n + 1) * A]
    m = m * (1.0 / N)                                           # (1, A)
    mx = jnp.max(m, axis=1, keepdims=True)
    s = m - mx
    lse = jnp.log(jnp.sum(jnp.exp(s), axis=1, keepdims=True))
    act_ref[0] = s - lse


# ------------------------------- wrapper ----------------------------------- #

def _resident(arr):
    """Whole-array block, constant index map: fetched once, resident in VMEM."""
    return pl.BlockSpec(arr.shape, lambda b, _nd=arr.ndim: (0,) * _nd)


def eqrdqn_forward(params, state_input_nchw, board_width, board_height, quantiles):
    B = state_input_nchw.shape[0]
    H, W = board_height, board_width
    A = board_width * board_height
    N = quantiles
    HW = H * W

    # Single entry transpose NCHW -> NHWC (channels on the lane axis).
    x = jnp.transpose(state_input_nchw, (0, 2, 3, 1)).astype(jnp.float32)

    # Weight prep (tiny, one-time under jit): tap-major im2col conv weights,
    # transposed 1x1-conv weight, bf16 cast of all matmul operands.
    w1 = params["conv1_w"].reshape(9 * 5, 32).astype(MATMUL_DTYPE)
    w2 = params["conv2_w"].reshape(9 * 32, 64).astype(MATMUL_DTYPE)
    w3 = params["conv3_w"].reshape(9 * 64, 128).astype(MATMUL_DTYPE)
    wa = params["act_conv1_w"].T.astype(MATMUL_DTYPE)            # (2, 128)
    wf1 = params["act_fc1_w"].astype(MATMUL_DTYPE)               # (2*HW, 64)
    wf2 = params["act_fc2_w"].astype(MATMUL_DTYPE)               # (64, N*A)
    b1 = params["conv1_b"].reshape(1, 32).astype(jnp.float32)
    b2 = params["conv2_b"].reshape(1, 64).astype(jnp.float32)
    b3 = params["conv3_b"].reshape(1, 128).astype(jnp.float32)
    ba = params["act_conv1_b"].reshape(2, 1).astype(jnp.float32)
    bf1 = params["act_fc1_b"].reshape(1, 64).astype(jnp.float32)
    bf2 = params["act_fc2_b"].reshape(1, A * N).astype(jnp.float32)

    kernel = functools.partial(fused_eqrdqn_kernel, H=H, W=W, A=A, N=N)

    act3, val_flat = pl.pallas_call(
        kernel,
        grid=(B,),
        out_shape=(jax.ShapeDtypeStruct((B, 1, A), jnp.float32),
                   jax.ShapeDtypeStruct((B, 1, N * A), jnp.float32)),
        in_specs=[
            pl.BlockSpec((1, H, W, 5), lambda b: (b, 0, 0, 0)),
            _resident(w1), _resident(b1),
            _resident(w2), _resident(b2),
            _resident(w3), _resident(b3),
            _resident(wa), _resident(ba),
            _resident(wf1), _resident(bf1),
            _resident(wf2), _resident(bf2),
        ],
        out_specs=(pl.BlockSpec((1, 1, A), lambda b: (b, 0, 0)),
                   pl.BlockSpec((1, 1, N * A), lambda b: (b, 0, 0))),
        scratch_shapes=[
            pltpu.VMEM((H + 2, W + 2, 64), jnp.float32),   # padded activations
            pltpu.VMEM((HW, 9 * 64), MATMUL_DTYPE),        # im2col patch buffer
        ],
        compiler_params=pltpu.CompilerParams(
            dimension_semantics=("parallel",)),
    )(x, w1, b1, w2, b2, w3, b3, wa, ba, wf1, bf1, wf2, bf2)

    x_act = act3.reshape(B, A)
    x_val = val_flat.reshape(B, N, A)     # row-major n*A + a, matches .view(-1, N, A)
    return x_act, x_val


# --------------------------- parameters (HWIO / in,out) --------------------- #

def init_params(key, board_width, board_height, quantiles):
    num_actions = board_width * board_height
    N = quantiles
    keys = jax.random.split(key, 12)

    def conv_w(k, cin, cout, ksz):
        fan_in = cin * ksz * ksz
        return jax.random.normal(k, (ksz, ksz, cin, cout), jnp.float32) / jnp.sqrt(fan_in)

    def lin_w(k, cin, cout):
        return jax.random.normal(k, (cin, cout), jnp.float32) / jnp.sqrt(cin)

    def bias(k, n):
        return 0.01 * jax.random.normal(k, (n,), jnp.float32)

    return {
        "conv1_w": conv_w(keys[0], 5, 32, 3),   "conv1_b": bias(keys[1], 32),
        "conv2_w": conv_w(keys[2], 32, 64, 3),  "conv2_b": bias(keys[3], 64),
        "conv3_w": conv_w(keys[4], 64, 128, 3), "conv3_b": bias(keys[5], 128),
        "act_conv1_w": lin_w(keys[6], 128, 2),  "act_conv1_b": bias(keys[7], 2),
        "act_fc1_w": lin_w(keys[8], 2 * board_width * board_height, 64),
        "act_fc1_b": bias(keys[9], 64),
        "act_fc2_w": lin_w(keys[10], 64, num_actions * N),
        "act_fc2_b": bias(keys[11], num_actions * N),
    }


if __name__ == "__main__":
    board_width = 8
    board_height = 8
    quantiles = 8
    batch = 2

    key = jax.random.PRNGKey(0)
    pkey, xkey = jax.random.split(key)
    params = init_params(pkey, board_width, board_height, quantiles)
    state_input = jax.random.normal(
        xkey, (batch, 5, board_height, board_width), jnp.float32)   # NCHW like PyTorch

    fwd = jax.jit(functools.partial(eqrdqn_forward,
                                    board_width=board_width,
                                    board_height=board_height,
                                    quantiles=quantiles))
    x_act, x_val = fwd(params, state_input)
    jax.block_until_ready((x_act, x_val))

    assert x_act.shape == (batch, board_width * board_height)
    assert x_val.shape == (batch, quantiles, board_width * board_height)
    assert bool(jnp.all(jnp.isfinite(x_act))) and bool(jnp.all(jnp.isfinite(x_val)))
    # log_softmax rows should sum (in prob space) to ~1
    assert jnp.allclose(jnp.sum(jnp.exp(x_act), axis=1), 1.0, atol=1e-4)
    print("KERNEL_OK")
</pallas_src>

<mosaic_0001>
module attributes {stable_mosaic.version = 11 : i64} {
  func.func @fused_eqrdqn_kernel(%arg0: i32, %arg1: memref<1x8x8x5xf32, #tpu.memory_space<vmem>>, %arg2: memref<45x32xbf16, #tpu.memory_space<vmem>>, %arg3: memref<1x32xf32, #tpu.memory_space<vmem>>, %arg4: memref<288x64xbf16, #tpu.memory_space<vmem>>, %arg5: memref<1x64xf32, #tpu.memory_space<vmem>>, %arg6: memref<576x128xbf16, #tpu.memory_space<vmem>>, %arg7: memref<1x128xf32, #tpu.memory_space<vmem>>, %arg8: memref<2x128xbf16, #tpu.memory_space<vmem>>, %arg9: memref<2x1xf32, #tpu.memory_space<vmem>>, %arg10: memref<128x64xbf16, #tpu.memory_space<vmem>>, %arg11: memref<1x64xf32, #tpu.memory_space<vmem>>, %arg12: memref<64x512xbf16, #tpu.memory_space<vmem>>, %arg13: memref<1x512xf32, #tpu.memory_space<vmem>>, %arg14: memref<1x1x64xf32, #tpu.memory_space<vmem>>, %arg15: memref<1x1x512xf32, #tpu.memory_space<vmem>>, %arg16: memref<10x10x64xf32, #tpu.memory_space<vmem>>, %arg17: memref<64x576xbf16, #tpu.memory_space<vmem>>) attributes {dimension_semantics = [#tpu.dimension_semantics<parallel>], iteration_bounds = array<i64: 2>, scalar_prefetch = 0 : i64, scratch_operands = 2 : i64, tpu.core_type = #tpu.core_type<tc>, window_params = [{transform_indices = @transform_0, window_bounds = array<i64: 1, 8, 8, 5>}, {pipeline_mode = #tpu.pipeline_mode<synchronous>, transform_indices = @transform_1, window_bounds = array<i64: 45, 32>}, {pipeline_mode = #tpu.pipeline_mode<synchronous>, transform_indices = @transform_2, window_bounds = array<i64: 1, 32>}, {pipeline_mode = #tpu.pipeline_mode<synchronous>, transform_indices = @transform_3, window_bounds = array<i64: 288, 64>}, {pipeline_mode = #tpu.pipeline_mode<synchronous>, transform_indices = @transform_4, window_bounds = array<i64: 1, 64>}, {pipeline_mode = #tpu.pipeline_mode<synchronous>, transform_indices = @transform_5, window_bounds = array<i64: 576, 128>}, {pipeline_mode = #tpu.pipeline_mode<synchronous>, transform_indices = @transform_6, window_bounds = array<i64: 1, 128>}, {pipeline_mode = #tpu.pipeline_mode<synchronous>, transform_indices = @transform_7, window_bounds = array<i64: 2, 128>}, {pipeline_mode = #tpu.pipeline_mode<synchronous>, transform_indices = @transform_8, window_bounds = array<i64: 2, 1>}, {pipeline_mode = #tpu.pipeline_mode<synchronous>, transform_indices = @transform_9, window_bounds = array<i64: 128, 64>}, {pipeline_mode = #tpu.pipeline_mode<synchronous>, transform_indices = @transform_10, window_bounds = array<i64: 1, 64>}, {pipeline_mode = #tpu.pipeline_mode<synchronous>, transform_indices = @transform_11, window_bounds = array<i64: 64, 512>}, {pipeline_mode = #tpu.pipeline_mode<synchronous>, transform_indices = @transform_12, window_bounds = array<i64: 1, 512>}, {transform_indices = @transform_13, window_bounds = array<i64: 1, 1, 64>}, {transform_indices = @transform_14, window_bounds = array<i64: 1, 1, 512>}]} {
    %cst = arith.constant 0.000000e+00 : f32
    %0 = vector.broadcast %cst : f32 to vector<10x10x64xf32>
    %c0 = arith.constant 0 : index
    %c0_0 = arith.constant 0 : index
    %c0_1 = arith.constant 0 : index
    %1 = vector.load %arg16[%c0, %c0_0, %c0_1] : memref<10x10x64xf32, #tpu.memory_space<vmem>>, vector<10x10x64xf32>
    tpu.vector_store %arg16[%c0, %c0_0, %c0_1], %0 {strides = array<i32>} : memref<10x10x64xf32, #tpu.memory_space<vmem>>, vector<10x10x64xf32>,
    %c0_2 = arith.constant 0 : index
    %c0_3 = arith.constant 0 : index
    %c0_4 = arith.constant 0 : index
    %c0_5 = arith.constant 0 : index
    %2 = vector.load %arg1[%c0_2, %c0_3, %c0_4, %c0_5] : memref<1x8x8x5xf32, #tpu.memory_space<vmem>>, vector<1x8x8x5xf32>
    %3 = vector.shape_cast %2 : vector<1x8x8x5xf32> to vector<8x8x5xf32>
    %c1 = arith.constant 1 : index
    %c1_6 = arith.constant 1 : index
    %c0_7 = arith.constant 0 : index
    %4 = vector.load %arg16[%c1, %c1_6, %c0_7] : memref<10x10x64xf32, #tpu.memory_space<vmem>>, vector<8x8x5xf32>
    tpu.vector_store %arg16[%c1, %c1_6, %c0_7], %3 {strides = array<i32>} : memref<10x10x64xf32, #tpu.memory_space<vmem>>, vector<8x8x5xf32>,
    %c0_8 = arith.constant 0 : index
    %c0_9 = arith.constant 0 : index
    %c0_10 = arith.constant 0 : index
    %5 = vector.load %arg16[%c0_8, %c0_9, %c0_10] : memref<10x10x64xf32, #tpu.memory_space<vmem>>, vector<8x8x5xf32>
    %6 = vector.shape_cast %5 : vector<8x8x5xf32> to vector<64x5xf32>
    %7 = arith.truncf %6 : vector<64x5xf32> to vector<64x5xbf16>
    %c0_11 = arith.constant 0 : index
    %c0_12 = arith.constant 0 : index
    %8 = vector.load %arg17[%c0_11, %c0_12] : memref<64x576xbf16, #tpu.memory_space<vmem>>, vector<64x5xbf16>
    tpu.vector_store %arg17[%c0_11, %c0_12], %7 {strides = array<i32>} : memref<64x576xbf16, #tpu.memory_space<vmem>>, vector<64x5xbf16>,
    %c0_13 = arith.constant 0 : index
    %c1_14 = arith.constant 1 : index
    %c0_15 = arith.constant 0 : index
    %9 = vector.load %arg16[%c0_13, %c1_14, %c0_15] : memref<10x10x64xf32, #tpu.memory_space<vmem>>, vector<8x8x5xf32>
    %10 = vector.shape_cast %9 : vector<8x8x5xf32> to vector<64x5xf32>
    %11 = arith.truncf %10 : vector<64x5xf32> to vector<64x5xbf16>
    %c0_16 = arith.constant 0 : index
    %c5 = arith.constant 5 : index
    %12 = vector.load %arg17[%c0_16, %c5] : memref<64x576xbf16, #tpu.memory_space<vmem>>, vector<64x5xbf16>
    tpu.vector_store %arg17[%c0_16, %c5], %11 {strides = array<i32>} : memref<64x576xbf16, #tpu.memory_space<vmem>>, vector<64x5xbf16>,
    %c0_17 = arith.constant 0 : index
    %c2 = arith.constant 2 : index
    %c0_18 = arith.constant 0 : index
    %13 = vector.load %arg16[%c0_17, %c2, %c0_18] : memref<10x10x64xf32, #tpu.memory_space<vmem>>, vector<8x8x5xf32>
    %14 = vector.shape_cast %13 : vector<8x8x5xf32> to vector<64x5xf32>
    %15 = arith.truncf %14 : vector<64x5xf32> to vector<64x5xbf16>
    %c0_19 = arith.constant 0 : index
    %c10 = arith.constant 10 : index
    %16 = vector.load %arg17[%c0_19, %c10] : memref<64x576xbf16, #tpu.memory_space<vmem>>, vector<64x5xbf16>
    tpu.vector_store %arg17[%c0_19, %c10], %15 {strides = array<i32>} : memref<64x576xbf16, #tpu.memory_space<vmem>>, vector<64x5xbf16>,
    %c1_20 = arith.constant 1 : index
    %c0_21 = arith.constant 0 : index
    %c0_22 = arith.constant 0 : index
    %17 = vector.load %arg16[%c1_20, %c0_21, %c0_22] : memref<10x10x64xf32, #tpu.memory_space<vmem>>, vector<8x8x5xf32>
    %18 = vector.shape_cast %17 : vector<8x8x5xf32> to vector<64x5xf32>
    %19 = arith.truncf %18 : vector<64x5xf32> to vector<64x5xbf16>
    %c0_23 = arith.constant 0 : index
    %c15 = arith.constant 15 : index
    %20 = vector.load %arg17[%c0_23, %c15] : memref<64x576xbf16, #tpu.memory_space<vmem>>, vector<64x5xbf16>
    tpu.vector_store %arg17[%c0_23, %c15], %19 {strides = array<i32>} : memref<64x576xbf16, #tpu.memory_space<vmem>>, vector<64x5xbf16>,
    %c1_24 = arith.constant 1 : index
    %c1_25 = arith.constant 1 : index
    %c0_26 = arith.constant 0 : index
    %21 = vector.load %arg16[%c1_24, %c1_25, %c0_26] : memref<10x10x64xf32, #tpu.memory_space<vmem>>, vector<8x8x5xf32>
    %22 = vector.shape_cast %21 : vector<8x8x5xf32> to vector<64x5xf32>
    %23 = arith.truncf %22 : vector<64x5xf32> to vector<64x5xbf16>
    %c0_27 = arith.constant 0 : index
    %c20 = arith.constant 20 : index
    %24 = vector.load %arg17[%c0_27, %c20] : memref<64x576xbf16, #tpu.memory_space<vmem>>, vector<64x5xbf16>
    tpu.vector_store %arg17[%c0_27, %c20], %23 {strides = array<i32>} : memref<64x576xbf16, #tpu.memory_space<vmem>>, vector<64x5xbf16>,
    %c1_28 = arith.constant 1 : index
    %c2_29 = arith.constant 2 : index
    %c0_30 = arith.constant 0 : index
    %25 = vector.load %arg16[%c1_28, %c2_29, %c0_30] : memref<10x10x64xf32, #tpu.memory_space<vmem>>, vector<8x8x5xf32>
    %26 = vector.shape_cast %25 : vector<8x8x5xf32> to vector<64x5xf32>
    %27 = arith.truncf %26 : vector<64x5xf32> to vector<64x5xbf16>
    %c0_31 = arith.constant 0 : index
    %c25 = arith.constant 25 : index
    %28 = vector.load %arg17[%c0_31, %c25] : memref<64x576xbf16, #tpu.memory_space<vmem>>, vector<64x5xbf16>
    tpu.vector_store %arg17[%c0_31, %c25], %27 {strides = array<i32>} : memref<64x576xbf16, #tpu.memory_space<vmem>>, vector<64x5xbf16>,
    %c2_32 = arith.constant 2 : index
    %c0_33 = arith.constant 0 : index
    %c0_34 = arith.constant 0 : index
    %29 = vector.load %arg16[%c2_32, %c0_33, %c0_34] : memref<10x10x64xf32, #tpu.memory_space<vmem>>, vector<8x8x5xf32>
    %30 = vector.shape_cast %29 : vector<8x8x5xf32> to vector<64x5xf32>
    %31 = arith.truncf %30 : vector<64x5xf32> to vector<64x5xbf16>
    %c0_35 = arith.constant 0 : index
    %c30 = arith.constant 30 : index
    %32 = vector.load %arg17[%c0_35, %c30] : memref<64x576xbf16, #tpu.memory_space<vmem>>, vector<64x5xbf16>
    tpu.vector_store %arg17[%c0_35, %c30], %31 {strides = array<i32>} : memref<64x576xbf16, #tpu.memory_space<vmem>>, vector<64x5xbf16>,
    %c2_36 = arith.constant 2 : index
    %c1_37 = arith.constant 1 : index
    %c0_38 = arith.constant 0 : index
    %33 = vector.load %arg16[%c2_36, %c1_37, %c0_38] : memref<10x10x64xf32, #tpu.memory_space<vmem>>, vector<8x8x5xf32>
    %34 = vector.shape_cast %33 : vector<8x8x5xf32> to vector<64x5xf32>
    %35 = arith.truncf %34 : vector<64x5xf32> to vector<64x5xbf16>
    %c0_39 = arith.constant 0 : index
    %c35 = arith.constant 35 : index
    %36 = vector.load %arg17[%c0_39, %c35] : memref<64x576xbf16, #tpu.memory_space<vmem>>, vector<64x5xbf16>
    tpu.vector_store %arg17[%c0_39, %c35], %35 {strides = array<i32>} : memref<64x576xbf16, #tpu.memory_space<vmem>>, vector<64x5xbf16>,
    %c2_40 = arith.constant 2 : index
    %c2_41 = arith.constant 2 : index
    %c0_42 = arith.constant 0 : index
    %37 = vector.load %arg16[%c2_40, %c2_41, %c0_42] : memref<10x10x64xf32, #tpu.memory_space<vmem>>, vector<8x8x5xf32>
    %38 = vector.shape_cast %37 : vector<8x8x5xf32> to vector<64x5xf32>
    %39 = arith.truncf %38 : vector<64x5xf32> to vector<64x5xbf16>
    %c0_43 = arith.constant 0 : index
    %c40 = arith.constant 40 : index
    %40 = vector.load %arg17[%c0_43, %c40] : memref<64x576xbf16, #tpu.memory_space<vmem>>, vector<64x5xbf16>
    tpu.vector_store %arg17[%c0_43, %c40], %39 {strides = array<i32>} : memref<64x576xbf16, #tpu.memory_space<vmem>>, vector<64x5xbf16>,
    %c0_44 = arith.constant 0 : index
    %c0_45 = arith.constant 0 : index
    %41 = vector.load %arg17[%c0_44, %c0_45] : memref<64x576xbf16, #tpu.memory_space<vmem>>, vector<64x45xbf16>
    %c0_46 = arith.constant 0 : index
    %c0_47 = arith.constant 0 : index
    %42 = vector.load %arg2[%c0_46, %c0_47] : memref<45x32xbf16, #tpu.memory_space<vmem>>, vector<45x32xbf16>
    %cst_48 = arith.constant dense<0.000000e+00> : vector<64x32xf32>
    %43 = tpu.matmul %41, %42, %cst_48 {dimension_numbers = #tpu.dot_dimension_numbers<[1], [0], [0], [1], [0, 0, 1, 1], [], []>} : vector<64x45xbf16>, vector<45x32xbf16>, vector<64x32xf32> -> vector<64x32xf32>
    %c0_49 = arith.constant 0 : index
    %c0_50 = arith.constant 0 : index
    %44 = vector.load %arg3[%c0_49, %c0_50] : memref<1x32xf32, #tpu.memory_space<vmem>>, vector<1x32xf32>
    %45 = vector.broadcast %44 : vector<1x32xf32> to vector<64x32xf32>
    %46 = arith.addf %43, %45 : vector<64x32xf32>
    %cst_51 = arith.constant 0.000000e+00 : f32
    %47 = vector.broadcast %cst_51 : f32 to vector<64x32xf32>
    %48 = arith.maximumf %46, %47 : vector<64x32xf32>
    %49 = vector.shape_cast %48 : vector<64x32xf32> to vector<8x8x32xf32>
    %c1_52 = arith.constant 1 : index
    %c1_53 = arith.constant 1 : index
    %c0_54 = arith.constant 0 : index
    %50 = vector.load %arg16[%c1_52, %c1_53, %c0_54] : memref<10x10x64xf32, #tpu.memory_space<vmem>>, vector<8x8x32xf32>
    tpu.vector_store %arg16[%c1_52, %c1_53, %c0_54], %49 {strides = array<i32>} : memref<10x10x64xf32, #tpu.memory_space<vmem>>, vector<8x8x32xf32>,
    %c0_55 = arith.constant 0 : index
    %c0_56 = arith.constant 0 : index
    %c0_57 = arith.constant 0 : index
    %51 = vector.load %arg16[%c0_55, %c0_56, %c0_57] : memref<10x10x64xf32, #tpu.memory_space<vmem>>, vector<8x8x32xf32>
    %52 = vector.shape_cast %51 : vector<8x8x32xf32> to vector<64x32xf32>
    %53 = arith.truncf %52 : vector<64x32xf32> to vector<64x32xbf16>
    %c0_58 = arith.constant 0 : index
    %c0_59 = arith.constant 0 : index
    %54 = vector.load %arg17[%c0_58, %c0_59] : memref<64x576xbf16, #tpu.memory_space<vmem>>, vector<64x32xbf16>
    tpu.vector_store %arg17[%c0_58, %c0_59], %53 {strides = array<i32>} : memref<64x576xbf16, #tpu.memory_space<vmem>>, vector<64x32xbf16>,
    %c0_60 = arith.constant 0 : index
    %c1_61 = arith.constant 1 : index
    %c0_62 = arith.constant 0 : index
    %55 = vector.load %arg16[%c0_60, %c1_61, %c0_62] : memref<10x10x64xf32, #tpu.memory_space<vmem>>, vector<8x8x32xf32>
    %56 = vector.shape_cast %55 : vector<8x8x32xf32> to vector<64x32xf32>
    %57 = arith.truncf %56 : vector<64x32xf32> to vector<64x32xbf16>
    %c0_63 = arith.constant 0 : index
    %c32 = arith.constant 32 : index
    %58 = vector.load %arg17[%c0_63, %c32] : memref<64x576xbf16, #tpu.memory_space<vmem>>, vector<64x32xbf16>
    tpu.vector_store %arg17[%c0_63, %c32], %57 {strides = array<i32>} : memref<64x576xbf16, #tpu.memory_space<vmem>>, vector<64x32xbf16>,
    %c0_64 = arith.constant 0 : index
    %c2_65 = arith.constant 2 : index
    %c0_66 = arith.constant 0 : index
    %59 = vector.load %arg16[%c0_64, %c2_65, %c0_66] : memref<10x10x64xf32, #tpu.memory_space<vmem>>, vector<8x8x32xf32>
    %60 = vector.shape_cast %59 : vector<8x8x32xf32> to vector<64x32xf32>
    %61 = arith.truncf %60 : vector<64x32xf32> to vector<64x32xbf16>
    %c0_67 = arith.constant 0 : index
    %c64 = arith.constant 64 : index
    %62 = vector.load %arg17[%c0_67, %c64] : memref<64x576xbf16, #tpu.memory_space<vmem>>, vector<64x32xbf16>
    tpu.vector_store %arg17[%c0_67, %c64], %61 {strides = array<i32>} : memref<64x576xbf16, #tpu.memory_space<vmem>>, vector<64x32xbf16>,
    %c1_68 = arith.constant 1 : index
    %c0_69 = arith.constant 0 : index
    %c0_70 = arith.constant 0 : index
    %63 = vector.load %arg16[%c1_68, %c0_69, %c0_70] : memref<10x10x64xf32, #tpu.memory_space<vmem>>, vector<8x8x32xf32>
    %64 = vector.shape_cast %63 : vector<8x8x32xf32> to vector<64x32xf32>
    %65 = arith.truncf %64 : vector<64x32xf32> to vector<64x32xbf16>
    %c0_71 = arith.constant 0 : index
    %c96 = arith.constant 96 : index
    %66 = vector.load %arg17[%c0_71, %c96] : memref<64x576xbf16, #tpu.memory_space<vmem>>, vector<64x32xbf16>
    tpu.vector_store %arg17[%c0_71, %c96], %65 {strides = array<i32>} : memref<64x576xbf16, #tpu.memory_space<vmem>>, vector<64x32xbf16>,
    %c1_72 = arith.constant 1 : index
    %c1_73 = arith.constant 1 : index
    %c0_74 = arith.constant 0 : index
    %67 = vector.load %arg16[%c1_72, %c1_73, %c0_74] : memref<10x10x64xf32, #tpu.memory_space<vmem>>, vector<8x8x32xf32>
    %68 = vector.shape_cast %67 : vector<8x8x32xf32> to vector<64x32xf32>
    %69 = arith.truncf %68 : vector<64x32xf32> to vector<64x32xbf16>
    %c0_75 = arith.constant 0 : index
    %c128 = arith.constant 128 : index
    %70 = vector.load %arg17[%c0_75, %c128] : memref<64x576xbf16, #tpu.memory_space<vmem>>, vector<64x32xbf16>
    tpu.vector_store %arg17[%c0_75, %c128], %69 {strides = array<i32>} : memref<64x576xbf16, #tpu.memory_space<vmem>>, vector<64x32xbf16>,
    %c1_76 = arith.constant 1 : index
    %c2_77 = arith.constant 2 : index
    %c0_78 = arith.constant 0 : index
    %71 = vector.load %arg16[%c1_76, %c2_77, %c0_78] : memref<10x10x64xf32, #tpu.memory_space<vmem>>, vector<8x8x32xf32>
    %72 = vector.shape_cast %71 : vector<8x8x32xf32> to vector<64x32xf32>
    %73 = arith.truncf %72 : vector<64x32xf32> to vector<64x32xbf16>
    %c0_79 = arith.constant 0 : index
    %c160 = arith.constant 160 : index
    %74 = vector.load %arg17[%c0_79, %c160] : memref<64x576xbf16, #tpu.memory_space<vmem>>, vector<64x32xbf16>
    tpu.vector_store %arg17[%c0_79, %c160], %73 {strides = array<i32>} : memref<64x576xbf16, #tpu.memory_space<vmem>>, vector<64x32xbf16>,
    %c2_80 = arith.constant 2 : index
    %c0_81 = arith.constant 0 : index
    %c0_82 = arith.constant 0 : index
    %75 = vector.load %arg16[%c2_80, %c0_81, %c0_82] : memref<10x10x64xf32, #tpu.memory_space<vmem>>, vector<8x8x32xf32>
    %76 = vector.shape_cast %75 : vector<8x8x32xf32> to vector<64x32xf32>
    %77 = arith.truncf %76 : vector<64x32xf32> to vector<64x32xbf16>
    %c0_83 = arith.constant 0 : index
    %c192 = arith.constant 192 : index
    %78 = vector.load %arg17[%c0_83, %c192] : memref<64x576xbf16, #tpu.memory_space<vmem>>, vector<64x32xbf16>
    tpu.vector_store %arg17[%c0_83, %c192], %77 {strides = array<i32>} : memref<64x576xbf16, #tpu.memory_space<vmem>>, vector<64x32xbf16>,
    %c2_84 = arith.constant 2 : index
    %c1_85 = arith.constant 1 : index
    %c0_86 = arith.constant 0 : index
    %79 = vector.load %arg16[%c2_84, %c1_85, %c0_86] : memref<10x10x64xf32, #tpu.memory_space<vmem>>, vector<8x8x32xf32>
    %80 = vector.shape_cast %79 : vector<8x8x32xf32> to vector<64x32xf32>
    %81 = arith.truncf %80 : vector<64x32xf32> to vector<64x32xbf16>
    %c0_87 = arith.constant 0 : index
    %c224 = arith.constant 224 : index
    %82 = vector.load %arg17[%c0_87, %c224] : memref<64x576xbf16, #tpu.memory_space<vmem>>, vector<64x32xbf16>
    tpu.vector_store %arg17[%c0_87, %c224], %81 {strides = array<i32>} : memref<64x576xbf16, #tpu.memory_space<vmem>>, vector<64x32xbf16>,
    %c2_88 = arith.constant 2 : index
    %c2_89 = arith.constant 2 : index
    %c0_90 = arith.constant 0 : index
    %83 = vector.load %arg16[%c2_88, %c2_89, %c0_90] : memref<10x10x64xf32, #tpu.memory_space<vmem>>, vector<8x8x32xf32>
    %84 = vector.shape_cast %83 : vector<8x8x32xf32> to vector<64x32xf32>
    %85 = arith.truncf %84 : vector<64x32xf32> to vector<64x32xbf16>
    %c0_91 = arith.constant 0 : index
    %c256 = arith.constant 256 : index
    %86 = vector.load %arg17[%c0_91, %c256] : memref<64x576xbf16, #tpu.memory_space<vmem>>, vector<64x32xbf16>
    tpu.vector_store %arg17[%c0_91, %c256], %85 {strides = array<i32>} : memref<64x576xbf16, #tpu.memory_space<vmem>>, vector<64x32xbf16>,
    %c0_92 = arith.constant 0 : index
    %c0_93 = arith.constant 0 : index
    %87 = vector.load %arg17[%c0_92, %c0_93] : memref<64x576xbf16, #tpu.memory_space<vmem>>, vector<64x288xbf16>
    %c0_94 = arith.constant 0 : index
    %c0_95 = arith.constant 0 : index
    %88 = vector.load %arg4[%c0_94, %c0_95] : memref<288x64xbf16, #tpu.memory_space<vmem>>, vector<288x64xbf16>
    %cst_96 = arith.constant dense<0.000000e+00> : vector<64x64xf32>
    %89 = tpu.matmul %87, %88, %cst_96 {dimension_numbers = #tpu.dot_dimension_numbers<[1], [0], [0], [1], [0, 0, 1, 1], [], []>} : vector<64x288xbf16>, vector<288x64xbf16>, vector<64x64xf32> -> vector<64x64xf32>
    %c0_97 = arith.constant 0 : index
    %c0_98 = arith.constant 0 : index
    %90 = vector.load %arg5[%c0_97, %c0_98] : memref<1x64xf32, #tpu.memory_space<vmem>>, vector<1x64xf32>
    %91 = vector.broadcast %90 : vector<1x64xf32> to vector<64x64xf32>
    %92 = arith.addf %89, %91 : vector<64x64xf32>
    %cst_99 = arith.constant 0.000000e+00 : f32
    %93 = vector.broadcast %cst_99 : f32 to vector<64x64xf32>
    %94 = arith.maximumf %92, %93 : vector<64x64xf32>
    %95 = vector.shape_cast %94 : vector<64x64xf32> to vector<8x8x64xf32>
    %c1_100 = arith.constant 1 : index
    %c1_101 = arith.constant 1 : index
    %c0_102 = arith.constant 0 : index
    %96 = vector.load %arg16[%c1_100, %c1_101, %c0_102] : memref<10x10x64xf32, #tpu.memory_space<vmem>>, vector<8x8x64xf32>
    tpu.vector_store %arg16[%c1_100, %c1_101, %c0_102], %95 {strides = array<i32>} : memref<10x10x64xf32, #tpu.memory_space<vmem>>, vector<8x8x64xf32>,
    %c0_103 = arith.constant 0 : index
    %c0_104 = arith.constant 0 : index
    %c0_105 = arith.constant 0 : index
    %97 = vector.load %arg16[%c0_103, %c0_104, %c0_105] : memref<10x10x64xf32, #tpu.memory_space<vmem>>, vector<8x8x64xf32>
    %98 = vector.shape_cast %97 : vector<8x8x64xf32> to vector<64x64xf32>
    %99 = arith.truncf %98 : vector<64x64xf32> to vector<64x64xbf16>
    %c0_106 = arith.constant 0 : index
    %c0_107 = arith.constant 0 : index
    %100 = vector.load %arg17[%c0_106, %c0_107] : memref<64x576xbf16, #tpu.memory_space<vmem>>, vector<64x64xbf16>
    tpu.vector_store %arg17[%c0_106, %c0_107], %99 {strides = array<i32>} : memref<64x576xbf16, #tpu.memory_space<vmem>>, vector<64x64xbf16>,
    %c0_108 = arith.constant 0 : index
    %c1_109 = arith.constant 1 : index
    %c0_110 = arith.constant 0 : index
    %101 = vector.load %arg16[%c0_108, %c1_109, %c0_110] : memref<10x10x64xf32, #tpu.memory_space<vmem>>, vector<8x8x64xf32>
    %102 = vector.shape_cast %101 : vector<8x8x64xf32> to vector<64x64xf32>
    %103 = arith.truncf %102 : vector<64x64xf32> to vector<64x64xbf16>
    %c0_111 = arith.constant 0 : index
    %c64_112 = arith.constant 64 : index
    %104 = vector.load %arg17[%c0_111, %c64_112] : memref<64x576xbf16, #tpu.memory_space<vmem>>, vector<64x64xbf16>
    tpu.vector_store %arg17[%c0_111, %c64_112], %103 {strides = array<i32>} : memref<64x576xbf16, #tpu.memory_space<vmem>>, vector<64x64xbf16>,
    %c0_113 = arith.constant 0 : index
    %c2_114 = arith.constant 2 : index
    %c0_115 = arith.constant 0 : index
    %105 = vector.load %arg16[%c0_113, %c2_114, %c0_115] : memref<10x10x64xf32, #tpu.memory_space<vmem>>, vector<8x8x64xf32>
    %106 = vector.shape_cast %105 : vector<8x8x64xf32> to vector<64x64xf32>
    %107 = arith.truncf %106 : vector<64x64xf32> to vector<64x64xbf16>
    %c0_116 = arith.constant 0 : index
    %c128_117 = arith.constant 128 : index
    %108 = vector.load %arg17[%c0_116, %c128_117] : memref<64x576xbf16, #tpu.memory_space<vmem>>, vector<64x64xbf16>
    tpu.vector_store %arg17[%c0_116, %c128_117], %107 {strides = array<i32>} : memref<64x576xbf16, #tpu.memory_space<vmem>>, vector<64x64xbf16>,
    %c1_118 = arith.constant 1 : index
    %c0_119 = arith.constant 0 : index
    %c0_120 = arith.constant 0 : index
    %109 = vector.load %arg16[%c1_118, %c0_119, %c0_120] : memref<10x10x64xf32, #tpu.memory_space<vmem>>, vector<8x8x64xf32>
    %110 = vector.shape_cast %109 : vector<8x8x64xf32> to vector<64x64xf32>
    %111 = arith.truncf %110 : vector<64x64xf32> to vector<64x64xbf16>
    %c0_121 = arith.constant 0 : index
    %c192_122 = arith.constant 192 : index
    %112 = vector.load %arg17[%c0_121, %c192_122] : memref<64x576xbf16, #tpu.memory_space<vmem>>, vector<64x64xbf16>
    tpu.vector_store %arg17[%c0_121, %c192_122], %111 {strides = array<i32>} : memref<64x576xbf16, #tpu.memory_space<vmem>>, vector<64x64xbf16>,
    %c1_123 = arith.constant 1 : index
    %c1_124 = arith.constant 1 : index
    %c0_125 = arith.constant 0 : index
    %113 = vector.load %arg16[%c1_123, %c1_124, %c0_125] : memref<10x10x64xf32, #tpu.memory_space<vmem>>, vector<8x8x64xf32>
    %114 = vector.shape_cast %113 : vector<8x8x64xf32> to vector<64x64xf32>
    %115 = arith.truncf %114 : vector<64x64xf32> to vector<64x64xbf16>
    %c0_126 = arith.constant 0 : index
    %c256_127 = arith.constant 256 : index
    %116 = vector.load %arg17[%c0_126, %c256_127] : memref<64x576xbf16, #tpu.memory_space<vmem>>, vector<64x64xbf16>
    tpu.vector_store %arg17[%c0_126, %c256_127], %115 {strides = array<i32>} : memref<64x576xbf16, #tpu.memory_space<vmem>>, vector<64x64xbf16>,
    %c1_128 = arith.constant 1 : index
    %c2_129 = arith.constant 2 : index
    %c0_130 = arith.constant 0 : index
    %117 = vector.load %arg16[%c1_128, %c2_129, %c0_130] : memref<10x10x64xf32, #tpu.memory_space<vmem>>, vector<8x8x64xf32>
    %118 = vector.shape_cast %117 : vector<8x8x64xf32> to vector<64x64xf32>
    %119 = arith.truncf %118 : vector<64x64xf32> to vector<64x64xbf16>
    %c0_131 = arith.constant 0 : index
    %c320 = arith.constant 320 : index
    %120 = vector.load %arg17[%c0_131, %c320] : memref<64x576xbf16, #tpu.memory_space<vmem>>, vector<64x64xbf16>
    tpu.vector_store %arg17[%c0_131, %c320], %119 {strides = array<i32>} : memref<64x576xbf16, #tpu.memory_space<vmem>>, vector<64x64xbf16>,
    %c2_132 = arith.constant 2 : index
    %c0_133 = arith.constant 0 : index
    %c0_134 = arith.constant 0 : index
    %121 = vector.load %arg16[%c2_132, %c0_133, %c0_134] : memref<10x10x64xf32, #tpu.memory_space<vmem>>, vector<8x8x64xf32>
    %122 = vector.shape_cast %121 : vector<8x8x64xf32> to vector<64x64xf32>
    %123 = arith.truncf %122 : vector<64x64xf32> to vector<64x64xbf16>
    %c0_135 = arith.constant 0 : index
    %c384 = arith.constant 384 : index
    %124 = vector.load %arg17[%c0_135, %c384] : memref<64x576xbf16, #tpu.memory_space<vmem>>, vector<64x64xbf16>
    tpu.vector_store %arg17[%c0_135, %c384], %123 {strides = array<i32>} : memref<64x576xbf16, #tpu.memory_space<vmem>>, vector<64x64xbf16>,
    %c2_136 = arith.constant 2 : index
    %c1_137 = arith.constant 1 : index
    %c0_138 = arith.constant 0 : index
    %125 = vector.load %arg16[%c2_136, %c1_137, %c0_138] : memref<10x10x64xf32, #tpu.memory_space<vmem>>, vector<8x8x64xf32>
    %126 = vector.shape_cast %125 : vector<8x8x64xf32> to vector<64x64xf32>
    %127 = arith.truncf %126 : vector<64x64xf32> to vector<64x64xbf16>
    %c0_139 = arith.constant 0 : index
    %c448 = arith.constant 448 : index
    %128 = vector.load %arg17[%c0_139, %c448] : memref<64x576xbf16, #tpu.memory_space<vmem>>, vector<64x64xbf16>
    tpu.vector_store %arg17[%c0_139, %c448], %127 {strides = array<i32>} : memref<64x576xbf16, #tpu.memory_space<vmem>>, vector<64x64xbf16>,
    %c2_140 = arith.constant 2 : index
    %c2_141 = arith.constant 2 : index
    %c0_142 = arith.constant 0 : index
    %129 = vector.load %arg16[%c2_140, %c2_141, %c0_142] : memref<10x10x64xf32, #tpu.memory_space<vmem>>, vector<8x8x64xf32>
    %130 = vector.shape_cast %129 : vector<8x8x64xf32> to vector<64x64xf32>
    %131 = arith.truncf %130 : vector<64x64xf32> to vector<64x64xbf16>
    %c0_143 = arith.constant 0 : index
    %c512 = arith.constant 512 : index
    %132 = vector.load %arg17[%c0_143, %c512] : memref<64x576xbf16, #tpu.memory_space<vmem>>, vector<64x64xbf16>
    tpu.vector_store %arg17[%c0_143, %c512], %131 {strides = array<i32>} : memref<64x576xbf16, #tpu.memory_space<vmem>>, vector<64x64xbf16>,
    %c0_144 = arith.constant 0 : index
    %c0_145 = arith.constant 0 : index
    %133 = vector.load %arg17[%c0_144, %c0_145] : memref<64x576xbf16, #tpu.memory_space<vmem>>, vector<64x576xbf16>
    %c0_146 = arith.constant 0 : index
    %c0_147 = arith.constant 0 : index
    %134 = vector.load %arg6[%c0_146, %c0_147] : memref<576x128xbf16, #tpu.memory_space<vmem>>, vector<576x128xbf16>
    %cst_148 = arith.constant dense<0.000000e+00> : vector<64x128xf32>
    %135 = tpu.matmul %133, %134, %cst_148 {dimension_numbers = #tpu.dot_dimension_numbers<[1], [0], [0], [1], [0, 0, 1, 1], [], []>} : vector<64x576xbf16>, vector<576x128xbf16>, vector<64x128xf32> -> vector<64x128xf32>
    %c0_149 = arith.constant 0 : index
    %c0_150 = arith.constant 0 : index
    %136 = vector.load %arg7[%c0_149, %c0_150] : memref<1x128xf32, #tpu.memory_space<vmem>>, vector<1x128xf32>
    %137 = vector.broadcast %136 : vector<1x128xf32> to vector<64x128xf32>
    %138 = arith.addf %135, %137 : vector<64x128xf32>
    %cst_151 = arith.constant 0.000000e+00 : f32
    %139 = vector.broadcast %cst_151 : f32 to vector<64x128xf32>
    %140 = arith.maximumf %138, %139 : vector<64x128xf32>
    %c0_152 = arith.constant 0 : index
    %c0_153 = arith.constant 0 : index
    %141 = vector.load %arg8[%c0_152, %c0_153] : memref<2x128xbf16, #tpu.memory_space<vmem>>, vector<2x128xbf16>
    %142 = arith.truncf %140 : vector<64x128xf32> to vector<64x128xbf16>
    %cst_154 = arith.constant dense<0.000000e+00> : vector<2x64xf32>
    %143 = tpu.matmul %141, %142, %cst_154 {dimension_numbers = #tpu.dot_dimension_numbers<[1], [1], [0], [0], [0, 0, 1, 0], [], []>} : vector<2x128xbf16>, vector<64x128xbf16>, vector<2x64xf32> -> vector<2x64xf32>
    %c0_155 = arith.constant 0 : index
    %c0_156 = arith.constant 0 : index
    %144 = vector.load %arg9[%c0_155, %c0_156] : memref<2x1xf32, #tpu.memory_space<vmem>>, vector<2x1xf32>
    %145 = vector.broadcast %144 : vector<2x1xf32> to vector<2x64xf32>
    %146 = arith.addf %143, %145 : vector<2x64xf32>
    %cst_157 = arith.constant 0.000000e+00 : f32
    %147 = vector.broadcast %cst_157 : f32 to vector<2x64xf32>
    %148 = arith.maximumf %146, %147 : vector<2x64xf32>
    %149 = arith.truncf %148 : vector<2x64xf32> to vector<2x64xbf16>
    %150 = vector.extract_strided_slice %149 {offsets = [0, 0], sizes = [1, 64], strides = [1, 1]} : vector<2x64xbf16> to vector<1x64xbf16>
    %c0_158 = arith.constant 0 : index
    %c0_159 = arith.constant 0 : index
    %151 = vector.load %arg10[%c0_158, %c0_159] : memref<128x64xbf16, #tpu.memory_space<vmem>>, vector<64x64xbf16>
    %cst_160 = arith.constant dense<0.000000e+00> : vector<1x64xf32>
    %152 = tpu.matmul %150, %151, %cst_160 {dimension_numbers = #tpu.dot_dimension_numbers<[1], [0], [0], [1], [0, 0, 1, 1], [], []>} : vector<1x64xbf16>, vector<64x64xbf16>, vector<1x64xf32> -> vector<1x64xf32>
    %153 = vector.extract_strided_slice %149 {offsets = [1, 0], sizes = [1, 64], strides = [1, 1]} : vector<2x64xbf16> to vector<1x64xbf16>
    %c64_161 = arith.constant 64 : index
    %c0_162 = arith.constant 0 : index
    %154 = vector.load %arg10[%c64_161, %c0_162] : memref<128x64xbf16, #tpu.memory_space<vmem>>, vector<64x64xbf16>
    %cst_163 = arith.constant dense<0.000000e+00> : vector<1x64xf32>
    %155 = tpu.matmul %153, %154, %cst_163 {dimension_numbers = #tpu.dot_dimension_numbers<[1], [0], [0], [1], [0, 0, 1, 1], [], []>} : vector<1x64xbf16>, vector<64x64xbf16>, vector<1x64xf32> -> vector<1x64xf32>
    %156 = arith.addf %152, %155 : vector<1x64xf32>
    %c0_164 = arith.constant 0 : index
    %c0_165 = arith.constant 0 : index
    %157 = vector.load %arg11[%c0_164, %c0_165] : memref<1x64xf32, #tpu.memory_space<vmem>>, vector<1x64xf32>
    %158 = arith.addf %156, %157 : vector<1x64xf32>
    %cst_166 = arith.constant 0.000000e+00 : f32
    %159 = vector.broadcast %cst_166 : f32 to vector<1x64xf32>
    %160 = arith.maximumf %158, %159 : vector<1x64xf32>
    %161 = arith.truncf %160 : vector<1x64xf32> to vector<1x64xbf16>
    %c0_167 = arith.constant 0 : index
    %c0_168 = arith.constant 0 : index
    %162 = vector.load %arg12[%c0_167, %c0_168] : memref<64x512xbf16, #tpu.memory_space<vmem>>, vector<64x512xbf16>
    %cst_169 = arith.constant dense<0.000000e+00> : vector<1x512xf32>
    %163 = tpu.matmul %161, %162, %cst_169 {dimension_numbers = #tpu.dot_dimension_numbers<[1], [0], [0], [1], [0, 0, 1, 1], [], []>} : vector<1x64xbf16>, vector<64x512xbf16>, vector<1x512xf32> -> vector<1x512xf32>
    %c0_170 = arith.constant 0 : index
    %c0_171 = arith.constant 0 : index
    %164 = vector.load %arg13[%c0_170, %c0_171] : memref<1x512xf32, #tpu.memory_space<vmem>>, vector<1x512xf32>
    %165 = arith.addf %163, %164 : vector<1x512xf32>
    %c0_172 = arith.constant 0 : index
    %c0_173 = arith.constant 0 : index
    %c0_174 = arith.constant 0 : index
    %166 = vector.load %arg15[%c0_172, %c0_173, %c0_174] : memref<1x1x512xf32, #tpu.memory_space<vmem>>, vector<1x1x512xf32>
    %167 = vector.shape_cast %166 : vector<1x1x512xf32> to vector<1x512xf32>
    %168 = vector.shape_cast %165 : vector<1x512xf32> to vector<1x1x512xf32>
    tpu.vector_store %arg15[%c0_172, %c0_173, %c0_174], %168 {strides = array<i32>} : memref<1x1x512xf32, #tpu.memory_space<vmem>>, vector<1x1x512xf32>,
    %169 = vector.extract_strided_slice %165 {offsets = [0, 0], sizes = [1, 64], strides = [1, 1]} : vector<1x512xf32> to vector<1x64xf32>
    %170 = vector.extract_strided_slice %165 {offsets = [0, 64], sizes = [1, 64], strides = [1, 1]} : vector<1x512xf32> to vector<1x64xf32>
    %171 = arith.addf %169, %170 : vector<1x64xf32>
    %172 = vector.extract_strided_slice %165 {offsets = [0, 128], sizes = [1, 64], strides = [1, 1]} : vector<1x512xf32> to vector<1x64xf32>
    %173 = arith.addf %171, %172 : vector<1x64xf32>
    %174 = vector.extract_strided_slice %165 {offsets = [0, 192], sizes = [1, 64], strides = [1, 1]} : vector<1x512xf32> to vector<1x64xf32>
    %175 = arith.addf %173, %174 : vector<1x64xf32>
    %176 = vector.extract_strided_slice %165 {offsets = [0, 256], sizes = [1, 64], strides = [1, 1]} : vector<1x512xf32> to vector<1x64xf32>
    %177 = arith.addf %175, %176 : vector<1x64xf32>
    %178 = vector.extract_strided_slice %165 {offsets = [0, 320], sizes = [1, 64], strides = [1, 1]} : vector<1x512xf32> to vector<1x64xf32>
    %179 = arith.addf %177, %178 : vector<1x64xf32>
    %180 = vector.extract_strided_slice %165 {offsets = [0, 384], sizes = [1, 64], strides = [1, 1]} : vector<1x512xf32> to vector<1x64xf32>
    %181 = arith.addf %179, %180 : vector<1x64xf32>
    %182 = vector.extract_strided_slice %165 {offsets = [0, 448], sizes = [1, 64], strides = [1, 1]} : vector<1x512xf32> to vector<1x64xf32>
    %183 = arith.addf %181, %182 : vector<1x64xf32>
    %cst_175 = arith.constant 1.250000e-01 : f32
    %184 = vector.broadcast %cst_175 : f32 to vector<1x64xf32>
    %185 = arith.mulf %183, %184 : vector<1x64xf32>
    %cst_176 = arith.constant dense<0xFF800000> : vector<1xf32>
    %186 = vector.multi_reduction <maximumf>, %185, %cst_176 [1] : vector<1x64xf32> to vector<1xf32>
    %187 = vector.shape_cast %186 : vector<1xf32> to vector<1x1xf32>
    %188 = vector.broadcast %187 : vector<1x1xf32> to vector<1x64xf32>
    %189 = arith.subf %185, %188 : vector<1x64xf32>
    %190 = math.exp %189 : vector<1x64xf32>
    %cst_177 = arith.constant dense<0.000000e+00> : vector<1xf32>
    %191 = vector.multi_reduction <add>, %190, %cst_177 [1] : vector<1x64xf32> to vector<1xf32>
    %192 = vector.shape_cast %191 : vector<1xf32> to vector<1x1xf32>
    %193 = math.log %192 : vector<1x1xf32>
    %194 = vector.broadcast %193 : vector<1x1xf32> to vector<1x64xf32>
    %195 = arith.subf %189, %194 : vector<1x64xf32>
    %c0_178 = arith.constant 0 : index
    %c0_179 = arith.constant 0 : index
    %c0_180 = arith.constant 0 : index
    %196 = vector.load %arg14[%c0_178, %c0_179, %c0_180] : memref<1x1x64xf32, #tpu.memory_space<vmem>>, vector<1x1x64xf32>
    %197 = vector.shape_cast %196 : vector<1x1x64xf32> to vector<1x64xf32>
    %198 = vector.shape_cast %195 : vector<1x64xf32> to vector<1x1x64xf32>
    tpu.vector_store %arg14[%c0_178, %c0_179, %c0_180], %198 {strides = array<i32>} : memref<1x1x64xf32, #tpu.memory_space<vmem>>, vector<1x1x64xf32>,
    return
  }
  func.func @transform_0(%arg0: i32) -> (i32, i32, i32, i32) {
    %c0_i32 = arith.constant 0 : i32
    %c0_i32_0 = arith.constant 0 : i32
    %c0_i32_1 = arith.constant 0 : i32
    %c0_i32_2 = arith.constant 0 : i32
    return %arg0, %c0_i32, %c0_i32_0, %c0_i32_1 : i32, i32, i32, i32
  }
  func.func @transform_1(%arg0: i32) -> (i32, i32) {
    %c0_i32 = arith.constant 0 : i32
    %c0_i32_0 = arith.constant 0 : i32
    %c0_i32_1 = arith.constant 0 : i32
    return %c0_i32, %c0_i32_0 : i32, i32
  }
  func.func @transform_2(%arg0: i32) -> (i32, i32) {
    %c0_i32 = arith.constant 0 : i32
    %c0_i32_0 = arith.constant 0 : i32
    %c0_i32_1 = arith.constant 0 : i32
    return %c0_i32, %c0_i32_0 : i32, i32
  }
  func.func @transform_3(%arg0: i32) -> (i32, i32) {
    %c0_i32 = arith.constant 0 : i32
    %c0_i32_0 = arith.constant 0 : i32
    %c0_i32_1 = arith.constant 0 : i32
    return %c0_i32, %c0_i32_0 : i32, i32
  }
  func.func @transform_4(%arg0: i32) -> (i32, i32) {
    %c0_i32 = arith.constant 0 : i32
    %c0_i32_0 = arith.constant 0 : i32
    %c0_i32_1 = arith.constant 0 : i32
    return %c0_i32, %c0_i32_0 : i32, i32
  }
  func.func @transform_5(%arg0: i32) -> (i32, i32) {
    %c0_i32 = arith.constant 0 : i32
    %c0_i32_0 = arith.constant 0 : i32
    %c0_i32_1 = arith.constant 0 : i32
    return %c0_i32, %c0_i32_0 : i32, i32
  }
  func.func @transform_6(%arg0: i32) -> (i32, i32) {
    %c0_i32 = arith.constant 0 : i32
    %c0_i32_0 = arith.constant 0 : i32
    %c0_i32_1 = arith.constant 0 : i32
    return %c0_i32, %c0_i32_0 : i32, i32
  }
  func.func @transform_7(%arg0: i32) -> (i32, i32) {
    %c0_i32 = arith.constant 0 : i32
    %c0_i32_0 = arith.constant 0 : i32
    %c0_i32_1 = arith.constant 0 : i32
    return %c0_i32, %c0_i32_0 : i32, i32
  }
  func.func @transform_8(%arg0: i32) -> (i32, i32) {
    %c0_i32 = arith.constant 0 : i32
    %c0_i32_0 = arith.constant 0 : i32
    %c0_i32_1 = arith.constant 0 : i32
    return %c0_i32, %c0_i32_0 : i32, i32
  }
  func.func @transform_9(%arg0: i32) -> (i32, i32) {
    %c0_i32 = arith.constant 0 : i32
    %c0_i32_0 = arith.constant 0 : i32
    %c0_i32_1 = arith.constant 0 : i32
    return %c0_i32, %c0_i32_0 : i32, i32
  }
  func.func @transform_10(%arg0: i32) -> (i32, i32) {
    %c0_i32 = arith.constant 0 : i32
    %c0_i32_0 = arith.constant 0 : i32
    %c0_i32_1 = arith.constant 0 : i32
    return %c0_i32, %c0_i32_0 : i32, i32
  }
  func.func @transform_11(%arg0: i32) -> (i32, i32) {
    %c0_i32 = arith.constant 0 : i32
    %c0_i32_0 = arith.constant 0 : i32
    %c0_i32_1 = arith.constant 0 : i32
    return %c0_i32, %c0_i32_0 : i32, i32
  }
  func.func @transform_12(%arg0: i32) -> (i32, i32) {
    %c0_i32 = arith.constant 0 : i32
    %c0_i32_0 = arith.constant 0 : i32
    %c0_i32_1 = arith.constant 0 : i32
    return %c0_i32, %c0_i32_0 : i32, i32
  }
  func.func @transform_13(%arg0: i32) -> (i32, i32, i32) {
    %c0_i32 = arith.constant 0 : i32
    %c0_i32_0 = arith.constant 0 : i32
    %c0_i32_1 = arith.constant 0 : i32
    return %arg0, %c0_i32, %c0_i32_0 : i32, i32, i32
  }
  func.func @transform_14(%arg0: i32) -> (i32, i32, i32) {
    %c0_i32 = arith.constant 0 : i32
    %c0_i32_0 = arith.constant 0 : i32
    %c0_i32_1 = arith.constant 0 : i32
    return %arg0, %c0_i32, %c0_i32_0 : i32, i32, i32
  }
}

</mosaic_0001>

<bundles_post_ra>
// kernel: eqrdqn_forward.1
= control target key start
LH: loop header
LB: loop body
LE: loop exit
PB: predicated region body
PF: predicated region fallthrough
CT: control target
= control target key end

     0   :  { %s4254_s0 = inlined_call_operand.vmem [shape: f32[2,8,8,5], index: 0, kind: input, shape index: {}]   ;;  %s4255_s1 = inlined_call_operand.vmem [shape: bf16[45,32], index: 1, kind: input, shape index: {}]   ;;  %s4256_s2 = inlined_call_operand.vmem [shape: f32[1,32], index: 2, kind: input, shape index: {}]   ;;  %s4257_s3 = inlined_call_operand.vmem [shape: bf16[288,64], index: 3, kind: input, shape index: {}]   ;;  %s4258_s4 = inlined_call_operand.vmem [shape: f32[1,64], index: 4, kind: input, shape index: {}]   ;;  %s4259_s5 = inlined_call_operand.vmem [shape: bf16[576,128], index: 5, kind: input, shape index: {}]   ;;  %s4260_s6 = inlined_call_operand.vmem [shape: f32[1,128], index: 6, kind: input, shape index: {}]   ;;  %s4261_s7 = inlined_call_operand.vmem [shape: bf16[2,128], index: 7, kind: input, shape index: {}]   ;;  %s4262_s8 = inlined_call_operand.vmem [shape: f32[2,1], index: 8, kind: input, shape index: {}]   ;;  %s4263_s9 = inlined_call_operand.vmem [shape: bf16[128,64], index: 9, kind: input, shape index: {}]   ;;  %s4264_s10 = inlined_call_operand.vmem [shape: f32[1,64], index: 10, kind: input, shape index: {}]   ;;  %s4265_s11 = inlined_call_operand.vmem [shape: bf16[64,512], index: 11, kind: input, shape index: {}]   ;;  %s4266_s12 = inlined_call_operand.vmem [shape: f32[1,512], index: 12, kind: input, shape index: {}]   ;;  %s4267_s13 = inlined_call_operand.hbm [shape: f32[2,1,64], index: 13, kind: output, shape index: {0}]   ;;  %s4268_s14 = inlined_call_operand.vmem [shape: f32[2,1,512], index: 14, kind: output, shape index: {1}]  }
   0x1   :  { %4282 = sst [smem:[#allocation9_spill]] %s4254_s0 }
   0x2   :  { %4283 = sst [smem:[#allocation10_spill]] %s4255_s1 }
   0x3   :  { %4284 = sst [smem:[#allocation11_spill]] %s4256_s2 }
   0x4   :  { %20 = vsyncpa [#allocation5], 0 }
   0x5   :  { %22 = vsyncpa [#allocation5 + $0x1], 0  ;;  %s3466_s29 = smov 0   ;;  %s3468_s30 = smov 0  }
   0x6   :  { %s3470_s15 = smov 0   ;;  %s3472_s16 = smov 0  }
   0x7 LB: > { %4285 = sst [smem:[#allocation7_spill]] %s3368_s15  ;;  %s3487_s17 = sadd.s32 4294967295, %s3372_s16   ;;  %s3372_s16 = sphi %s3472_s16, %s4302_s16   ;;  %s3368_s15 = sphi %s3470_s15, %s4299_s15   ;;  %s3364_s30 = sphi %s3468_s30, %s4301_s30   ;;  %s3360_s29 = sphi %s3466_s29, %s4300_s29  }
   0x8   : > { %s2816_s18 = sadd.s32 4294967294, %s3372_s16   ;;  %s3491_s19 = sadd.s32 1, %s3372_s16  }
   0x9   : > { %s313_s20 = sadd.s32 1, %s3368_s15  ;;  %s310_s21 = ssub.s32 %s3372_s16, %s3491_s19 }
   0xa   : > { %p323_p0 = scmp.ne.s32.totalorder %s3368_s15, %s3364_s30  ;;  %p311_p1 = scmp.eq.s32.totalorder %s310_s21, 0 }
   0xb   : > { %p324_p2 = scmp.eq.s32.totalorder %s3487_s17, 1  ;;  %p329_p3 = scmp.ne.s32.totalorder %s3364_s30, %s3360_s29 }
   0xc   : > { %p330_p4 = scmp.eq.s32.totalorder %s2816_s18, 1  ;;  %p2819_p7 = scmp.ge.s32.totalorder %s3372_s16, 1 }
   0xd   : > { %s3502_s22 = scalar_select %p311_p1, %s3368_s15, %s313_s20  }
   0xe   : > { %p3504_p5 = por %p324_p2, %p323_p0  ;;  %p3508_p6 = por %p330_p4, %p329_p3 }
   0xf   : > { %4286 = sst [smem:[#allocation8_spill]] %s3502_s22  ;;  %p418_p8 = scmp.lt.s32.totalorder %s3372_s16, 3 }
  0x11   : > { %p419_p9 = pnand %p2819_p7, %p418_p8 }
  0x12   : > { %p467_p10 = scmp.lt.s32.totalorder (!%p419_p9), %s3487_s17, 1  ;;  %vm477_vm0 = vcmask (!%p419_p9), 523264   ;;  %vm479_vm1 = vcmask (!%p419_p9), 517120   ;;  %v3374_v0 = vmov (!%p419_p9), 0.0   ;;  %vm508_vm2 = vcmask (!%p419_p9), 39936   ;;  %s4289_s0 = sld [smem:[#allocation9_spill]] (!%p419_p9) }
  0x13   : > { %422 = sbr.rel (%p419_p9) target bundleno = 2336 (0x920), region = 72  ;;  %478 = vst.msk [vmem:[#allocation2] sm:$0xff] (!%p419_p9), %vm477_vm0, %v3374_v0  ;;  %481 = vst.msk [vmem:[#allocation2 + $0x10] sm:$0xff] (!%p419_p9), %vm477_vm0, %v3374_v0  ;;  %s4271_s20 = smov (!%p419_p9), 5   ;;  %vm845_vm3 = vcmask (!%p419_p9), 1045504   ;;  %vm846_vm4 = vcmask (!%p419_p9), 1046528  }
  0x14   : > { %480 = vst.msk [vmem:[#allocation2 + $0x8] sm:$0x3] (!%p419_p9), %vm479_vm1, %v3374_v0  ;;  %482 = vst.msk [vmem:[#allocation2 + $0x18] sm:$0x3] (!%p419_p9), %vm479_vm1, %v3374_v0  ;;  %s4269_s21 = smov (!%p419_p9), 10   ;;  %s4290_s1 = sld [smem:[#allocation10_spill]] (!%p419_p9) }
  0x15   : > { %483 = vst.msk [vmem:[#allocation2 + $0x20] sm:$0xff] (!%p419_p9), %vm477_vm0, %v3374_v0  ;;  %485 = vst.msk [vmem:[#allocation2 + $0x30] sm:$0xff] (!%p419_p9), %vm477_vm0, %v3374_v0  ;;  %v3380_v45 = vmov (!%p419_p9), 65535   ;;  %s3383_s27 = smov (!%p419_p9), 40   ;;  %s4291_s28 = smov (!%p419_p9), 5   ;;  %vm561_vm5 = vcmask (!%p419_p9), 80936  }
  0x16   : > { %484 = vst.msk [vmem:[#allocation2 + $0x28] sm:$0x3] (!%p419_p9), %vm479_vm1, %v3374_v0  ;;  %486 = vst.msk [vmem:[#allocation2 + $0x38] sm:$0x3] (!%p419_p9), %vm479_vm1, %v3374_v0  ;;  %v847_v46 = vsel (!%p419_p9), %vm845_vm3, 4294967295, %v3380_v45  ;;  %vm594_vm6 = vcmask (!%p419_p9), 121936  }
  0x17   : > { %487 = vst.msk [vmem:[#allocation2 + $0x40] sm:$0xff] (!%p419_p9), %vm477_vm0, %v3374_v0  ;;  %489 = vst.msk [vmem:[#allocation2 + $0x50] sm:$0xff] (!%p419_p9), %vm477_vm0, %v3374_v0  ;;  %v848_v47 = vsel (!%p419_p9), %vm846_vm4, %v847_v46, 0  ;;  %vm627_vm7 = vcmask (!%p419_p9), 162936   ;;  %vm660_vm8 = vcmask (!%p419_p9), 203936   ;;  %vm693_vm9 = vcmask (!%p419_p9), 244936  }
  0x18   : > { %488 = vst.msk [vmem:[#allocation2 + $0x48] sm:$0x3] (!%p419_p9), %vm479_vm1, %v3374_v0  ;;  %490 = vst.msk [vmem:[#allocation2 + $0x58] sm:$0x3] (!%p419_p9), %vm479_vm1, %v3374_v0  ;;  %vm727_vm10 = vcmask (!%p419_p9), 285936   ;;  %vm760_vm11 = vcmask (!%p419_p9), 326936  }
  0x19   : > { %491 = vst.msk [vmem:[#allocation2 + $0x60] sm:$0xff] (!%p419_p9), %vm477_vm0, %v3374_v0  ;;  %493 = vst.msk [vmem:[#allocation2 + $0x70] sm:$0xff] (!%p419_p9), %vm477_vm0, %v3374_v0  ;;  %vm793_vm12 = vcmask (!%p419_p9), 367936   ;;  %vm832_vm13 = vcmask (!%p419_p9), 367616   ;;  %s4296_s2 = sld [smem:[#allocation11_spill]] (!%p419_p9)  ;;  %vm925_vm14 = vcmask (!%p419_p9), 261120  }
  0x1a   : > { %492 = vst.msk [vmem:[#allocation2 + $0x68] sm:$0x3] %vm479_vm1, %v3374_v0  ;;  %494 = vst.msk [vmem:[#allocation2 + $0x78] sm:$0x3] %vm479_vm1, %v3374_v0  ;;  %s3558_s25 = scalar_select %p467_p10, %s3487_s17, 1  ;;  %v3576_v11 = vld [vmem:[#allocation2] sm:$0xff] }
  0x1b   : > { %495 = vst.msk [vmem:[#allocation2 + $0x80] sm:$0xff] %vm477_vm0, %v3374_v0  ;;  %497 = vst.msk [vmem:[#allocation2 + $0x90] sm:$0xff] %vm477_vm0, %v3374_v0  ;;  %v3571_v9 = vld [vmem:[#allocation2 + $0x1] sm:$0xff]  ;;  %v3219_v44 = vld [vmem:[%s4290_s1 + $0x10] sm:$0x7f]   ;;  %vm978_vm15 = vcmask 523520  }
  0x1c   : > { %496 = vst.msk [vmem:[#allocation2 + $0x88] sm:$0x3] %vm479_vm1, %v3374_v0  ;;  %498 = vst.msk [vmem:[#allocation2 + $0x98] sm:$0x3] %vm479_vm1, %v3374_v0  ;;  %s2926_s26 = sshll.u32 %s3558_s25, 6  ;;  %v3573_v10 = vld [vmem:[#allocation2 + $0x2] sm:$0xff]  ;;  %v850_v48 = vand.u32 %v3219_v44, %v848_v47 }
  0x1d   : > { %s471_s18 = scalar_lea.vmem %s4289_s0, %s2926_s26  ;;  %s4273_s26 = smov 15   ;;  %v3217_v39 = vld [vmem:[%s4290_s1] sm:$0xff]   ;;  %v3218_v42 = vld [vmem:[%s4290_s1 + $0x8] sm:$0xff]   ;;  %vm1011_vm1 = vcmask 785920   ;;  %vm1542_vm3 = vcmask 1048064   ;;  %vm3387_vm4 = vmmov 0  }
  0x1e   : > { %v499_v1 = vld [vmem:[%s471_s18] sm:$0xff]  ;;  %v500_v2 = vld [vmem:[%s471_s18 + $0x8] sm:$0xff]  ;;  %v501_v3 = vld [vmem:[%s471_s18 + $0x10] sm:$0xff]  ;;  %3083 = vmatprep.subr.bf16.mxu0 %v3217_v39  ;;  %s3384_s0 = smov 32   ;;  %s4297_s1 = smov 64  }
  0x1f   : > { %509 = vst.msk [vmem:[#allocation2 + $0x11] sm:$0xff] %vm508_vm2, %v499_v1  ;;  %510 = vst.msk [vmem:[#allocation2 + $0x21] sm:$0xff] %vm508_vm2, %v500_v2  ;;  %v502_v4 = vld [vmem:[%s471_s18 + $0x18] sm:$0xff]  ;;  %v503_v5 = vld [vmem:[%s471_s18 + $0x20] sm:$0xff]  ;;  %3084 = vmatpush3.bf16.msra.mxu0 %v3217_v39 }
  0x20   : > { %511 = vst.msk [vmem:[#allocation2 + $0x31] sm:$0xff] %vm508_vm2, %v501_v3  ;;  %v504_v6 = vld [vmem:[%s471_s18 + $0x28] sm:$0xff]  ;;  %512 = vst.msk [vmem:[#allocation2 + $0x41] sm:$0xff] %vm508_vm2, %v502_v4  ;;  %v505_v7 = vld [vmem:[%s471_s18 + $0x30] sm:$0xff]  ;;  %3085 = vmatprep.subr.bf16.mxu0 %v3218_v42 }
  0x21   : > { %513 = vst.msk [vmem:[#allocation2 + $0x51] sm:$0xff] %vm508_vm2, %v503_v5  ;;  %514 = vst.msk [vmem:[#allocation2 + $0x61] sm:$0xff] %vm508_vm2, %v504_v6  ;;  %v506_v8 = vld [vmem:[%s471_s18 + $0x38] sm:$0xff]  ;;  %s3378_s18 = smov 20  }
  0x22   : > { %515 = vst.msk [vmem:[#allocation2 + $0x71] sm:$0xff] %vm508_vm2, %v505_v7  ;;  %516 = vst.msk [vmem:[#allocation2 + $0x81] sm:$0xff] %vm508_vm2, %v506_v8  ;;  %v3633_v4 = vld [vmem:[#allocation2 + $0x90] sm:$0xff] }
  0x23   : > { %3086 = vmatpush3.bf16.msra.mxu0 %v3218_v42  ;;  %v3638_v6 = vld [vmem:[#allocation2 + $0x91] sm:$0xff] }
  0x24   : > { %3087 = vmatprep.subr.bf16.mxu0 %v850_v48  ;;  %v3644_v8 = vld [vmem:[#allocation2 + $0x92] sm:$0xff] }
  0x26   : > { %v534_v12 = vld [vmem:[#allocation2 + $0x11] sm:$0xff]  ;;  %v535_v14 = vld [vmem:[#allocation2 + $0x21] sm:$0xff] }
  0x27   : > { %v567_v13 = vld [vmem:[#allocation2 + $0x12] sm:$0xff]  ;;  %v541_v15 = vpack.c.bf16 %v534_v12, %v3571_v9  ;;  %v568_v18 = vld [vmem:[#allocation2 + $0x22] sm:$0xff]  ;;  %v640_v36 = vpack.c.bf16 %v535_v14, %v534_v12  ;;  %3088 = vmatpush3.bf16.msra.mxu0 %v850_v48 }
  0x28   : > { %v574_v16 = vpack.c.bf16 %v567_v13, %v3573_v10  ;;  %v536_v17 = vld [vmem:[#allocation2 + $0x31] sm:$0xff]  ;;  %v600_v22 = vld [vmem:[#allocation2 + $0x20] sm:$0xff]  ;;  %v673_v40 = vpack.c.bf16 %v568_v18, %v567_v13 }
  0x29   : > { %v569_v19 = vld [vmem:[#allocation2 + $0x32] sm:$0xff]  ;;  %v542_v20 = vpack.c.bf16 %v536_v17, %v535_v14  ;;  %549 = vrot.lane.b32.xlu0 %v541_v15, %s4271_s20  ;;  %v602_v27 = vld [vmem:[#allocation2 + $0x40] sm:$0xff] }
  0x2a   : > { %v599_v21 = vld [vmem:[#allocation2 + $0x10] sm:$0xff]  ;;  %582 = vrot.lane.b32.xlu1 %v574_v16, %s4269_s21  ;;  %v575_v24 = vpack.c.bf16 %v569_v19, %v568_v18  ;;  %v3588_v30 = vld [vmem:[#allocation2 + $0x60] sm:$0xff] }
  0x2b   : > { %v601_v23 = vld [vmem:[#allocation2 + $0x30] sm:$0xff]  ;;  %v525_v26 = vpack.c.bf16 %v599_v21, %v3576_v11  ;;  %v607_v32 = vpack.c.bf16 %v600_v22, %v599_v21  ;;  %v635_v34 = vld [vmem:[#allocation2 + $0x41] sm:$0xff] }
  0x2c   : > { %v707_v25 = vpack.c.bf16 %v601_v23, %v600_v22  ;;  %v3583_v28 = vld [vmem:[#allocation2 + $0x50] sm:$0xff]  ;;  %v608_v33 = vpack.c.bf16 %v602_v27, %v601_v23  ;;  %v641_v37 = vpack.c.bf16 %v635_v34, %v536_v17  ;;  %v668_v38 = vld [vmem:[#allocation2 + $0x42] sm:$0xff] }
  0x2d   : > { %v708_v29 = vpack.c.bf16 %v3583_v28, %v602_v27  ;;  %529 = vst.msk [vmem:[#allocation3] sm:$0xff] %vm508_vm2, %v525_v26  ;;  %v3590_v31 = vld [vmem:[#allocation2 + $0x70] sm:$0xff]  ;;  %551 = vrot.lane.b32.xlu0 %v542_v20, %s4271_s20  ;;  %v674_v41 = vpack.c.bf16 %v668_v38, %v569_v19  ;;  %s4275_s20 = smov 30   ;;  %v539_v51 = vld [vmem:[#allocation2 + $0x61] sm:$0xff]  ;;  %v609_v59 = vpack.c.bf16 %v3588_v30, %v3583_v28 }
  0x2e   : > { %530 = vst.msk [vmem:[#allocation3 + $0x28] sm:$0xff] %vm508_vm2, %v707_v25  ;;  %584 = vrot.lane.b32.xlu1 %v575_v24, %s4269_s21  ;;  %v3596_v35 = vpack.c.bf16 %v3590_v31, %v3588_v30  ;;  %v735_v43 = vld [vmem:[#allocation2 + $0x51] sm:$0xff]  ;;  %s4277_s21 = smov 35   ;;  %v572_v54 = vld [vmem:[#allocation2 + $0x62] sm:$0xff] }
  0x2f   : > { %531 = vst.msk [vmem:[#allocation3 + $0x50] sm:$0xff] %vm508_vm2, %v708_v29  ;;  %v741_v49 = vpack.c.bf16 %v735_v43, %v635_v34  ;;  %v768_v50 = vld [vmem:[#allocation2 + $0x52] sm:$0xff]  ;;  %v606_v58 = vld [vmem:[#allocation2 + $0x80] sm:$0xff]  ;;  %v642_v62 = vpack.c.bf16 %v539_v51, %v735_v43 }
  0x30   : > { %532 = vst.msk [vmem:[#allocation3 + $0x78] sm:$0xff] %vm508_vm2, %v3596_v35  ;;  %v774_v52 = vpack.c.bf16 %v768_v50, %v668_v38  ;;  %v540_v53 = vld [vmem:[#allocation2 + $0x71] sm:$0xff]  ;;  %v610_v60 = vpack.c.bf16 %v606_v58, %v3590_v31  ;;  %v639_v61 = vld [vmem:[#allocation2 + $0x81] sm:$0xff]  ;;  %v675_v2 = vpack.c.bf16 %v572_v54, %v768_v50  ;;  %v710_v5 = vpack.c.bf16 %v3633_v4, %v606_v58 }
  0x31   : > { %615 = vrot.lane.b32.xlu0 %v607_v32, %s4273_s26  ;;  %v544_v55 = vpack.c.bf16 %v540_v53, %v539_v51  ;;  %v573_v56 = vld [vmem:[#allocation2 + $0x72] sm:$0xff]  ;;  %v643_v63 = vpack.c.bf16 %v639_v61, %v540_v53  ;;  %v672_v1 = vld [vmem:[#allocation2 + $0x82] sm:$0xff]  ;;  %v743_v7 = vpack.c.bf16 %v3638_v6, %v639_v61  ;;  %vm1044_vm2 = vcmask 1048320  }
  0x32   : > { %617 = vrot.lane.b32.xlu1 %v608_v33, %s4273_s26  ;;  %s3379_s26 = smov 25   ;;  %v577_v57 = vpack.c.bf16 %v573_v56, %v572_v54  ;;  %v676_v3 = vpack.c.bf16 %v672_v1, %v573_v56  ;;  %v776_v12 = vpack.c.bf16 %v3644_v8, %v672_v1  ;;  %v3221_v50 = vld [vmem:[%s4257_s3 + $0x88] sm:$0xff]   ;;  %v3222_v51 = vld [vmem:[%s4257_s3 + $0x40] sm:$0xff]   ;;  %v3227_v56 = vld [vmem:[%s4257_s3 + $0x10] sm:$0xff]  }
  0x33   : > { %v3224_v53 = vld [vmem:[%s4257_s3 + $0x48] sm:$0xff]   ;;  %2934 = vmatprep.subr.bf16.mxu1 %v3222_v51 }
  0x34   : > { %v3225_v54 = vld [vmem:[%s4257_s3 + $0x8] sm:$0xff]  }
  0x35   : > { %648 = vrot.lane.b32.xlu0 %v640_v36, %s3378_s18 }
  0x36   : > { %650 = vrot.lane.b32.xlu1 %v641_v37, %s3378_s18 }
  0x39   : > { %681 = vrot.lane.b32.xlu0 %v673_v40, %s3379_s26 }
  0x3a   : > { %683 = vrot.lane.b32.xlu1 %v674_v41, %s3379_s26 }
  0x3d   : > { %715 = vrot.lane.b32.xlu0 %v707_v25, %s4275_s20 }
  0x3e   : > { %717 = vrot.lane.b32.xlu1 %v708_v29, %s4275_s20  ;;  %s4292_s20 = smov 10  }
  0x41   : > { %748 = vrot.lane.b32.xlu0 %v542_v20, %s4277_s21 }
  0x42   : > { %750 = vrot.lane.b32.xlu1 %v741_v49, %s4277_s21  ;;  %s4293_s21 = smov 15  }
  0x45   : > { %781 = vrot.lane.b32.xlu0 %v575_v24, %s3383_s27 }
  0x46   : > { %783 = vrot.lane.b32.xlu1 %v774_v52, %s3383_s27 }
  0x49   : > { %553 = vrot.lane.b32.xlu0 %v741_v49, %s4291_s28  ;;  %v3220_v49 = vld [vmem:[%s4257_s3 + $0x80] sm:$0xff]  }
  0x4a   : > { %555 = vrot.lane.b32.xlu1 %v544_v55, %s4291_s28  ;;  %3097 = vmatprep.subr.bf16.mxu0 %v3220_v49 }
  0x4d   : > { %586 = vrot.lane.b32.xlu0 %v774_v52, %s4292_s20  ;;  %v3223_v52 = vld [vmem:[%s4257_s3] sm:$0xff]  }
  0x4e   : > { %588 = vrot.lane.b32.xlu1 %v577_v57, %s4292_s20  ;;  %s4294_s20 = smov 30   ;;  %2935 = vmatpush3.bf16.msra.mxu1 %v3223_v52 }
  0x4f   : > { %2936 = vmatprep.subr.bf16.mxu1 %v3224_v53 }
  0x51   : > { %619 = vrot.lane.b32.xlu0 %v609_v59, %s4293_s21 }
  0x52   : > { %621 = vrot.lane.b32.xlu1 %v610_v60, %s4293_s21  ;;  %2937 = vmatpush3.bf16.msra.mxu1 %v3225_v54  ;;  %s3386_s21 = smov 96  }
  0x55   : > { %652 = vrot.lane.b32.xlu0 %v642_v62, %s3378_s18 }
  0x56   : > { %654 = vrot.lane.b32.xlu1 %v643_v63, %s3378_s18  ;;  %s4295_s18 = smov 35  }
  0x59   : > { %685 = vrot.lane.b32.xlu0 %v675_v2, %s3379_s26 }
  0x5a   : > { %687 = vrot.lane.b32.xlu1 %v676_v3, %s3379_s26 }
  0x5d   : > { %719 = vrot.lane.b32.xlu0 %v3596_v35, %s4294_s20 }
  0x5e   : > { %721 = vrot.lane.b32.xlu1 %v710_v5, %s4294_s20 }
  0x61   : > { %752 = vrot.lane.b32.xlu0 %v544_v55, %s4295_s18  ;;  %v3226_v55 = vld [vmem:[%s4257_s3 + $0x50] sm:$0xff]  }
  0x62   : > { %754 = vrot.lane.b32.xlu1 %v743_v7, %s4295_s18  ;;  %2938 = vmatprep.subr.bf16.mxu1 %v3226_v55  ;;  %v3228_v7 = vld [vmem:[%s4257_s3 + $0x58] sm:$0xff]   ;;  %s4280_s18 = smov 64  }
  0x63   : > { %2939 = vmatpush3.bf16.msra.mxu1 %v3227_v56 }
  0x64   : > { %2940 = vmatprep.subr.bf16.mxu1 %v3228_v7 }
  0x65   : > { %785 = vrot.lane.b32.xlu0 %v577_v57, %s3383_s27  ;;  %v3714_v57 = vld [vmem:[%s4296_s2] ss:$0 sm:$0xff] }
  0x66   : > { %787 = vrot.lane.b32.xlu1 %v776_v12, %s3383_s27  ;;  %v3229_v12 = vld [vmem:[%s4257_s3 + $0x18] sm:$0xff]   ;;  %s2822_s27 = sshll.u32 %s3558_s25, 2  ;;  %s459_s25 = sand.u32 1, %s3364_s30  }
  0x67   : > { %2941 = vmatpush3.bf16.msra.mxu1 %v3229_v12  ;;  %s475_s15 = scalar_lea.vmem %s4268_s14, %s2822_s27  ;;  %s460_s22 = scalar_lea.vmem [#allocation4], %s459_s25 }
  0x68   : > { %s2734_s26 = sshll.u32 %s460_s22, 4  ;;  %s4213_s26 = int_to_ptr.vmem [resolvable:$true] %s2734_s26 }
  0x69   : > { %s3310_s27 = scalar_lea.vmem %s4213_s26, 16 }
  0x6a   : > { %p3311_p11 = scmp.ne.s32.totalorder %s4213_s26, %s3310_s27 }
  0x6c   : > { %p3312_p12 = pnand %p3311_p11, %p3504_p5 }
  0x6e   : > { %p3313_p13 = pneg %p3312_p12 }
  0x9b   : > { %v550_v13 = vpop.permute.xlu0 %549 }
  0x9c   : > { %v583_v14 = vpop.permute.xlu1 %582  ;;  %562 = vst.msk [vmem:[#allocation3] sm:$0xff] %vm561_vm5, %v550_v13 }
  0x9d   : > { %595 = vst.msk [vmem:[#allocation3] sm:$0xff] %vm594_vm6, %v583_v14 }
  0x9f   : > { %v552_v15 = vpop.permute.xlu0 %551 }
  0xa0   : > { %v585_v16 = vpop.permute.xlu1 %584  ;;  %563 = vst.msk [vmem:[#allocation3 + $0x28] sm:$0xff] %vm561_vm5, %v552_v15  ;;  %v3230_v15 = vld [vmem:[%s4257_s3 + $0x60] sm:$0xff]  }
  0xa1   : > { %596 = vst.msk [vmem:[#allocation3 + $0x28] sm:$0xff] %vm594_vm6, %v585_v16  ;;  %v3231_v16 = vld [vmem:[%s4257_s3 + $0x20] sm:$0xff]   ;;  %2942 = vmatprep.subr.bf16.mxu1 %v3230_v15 }
  0xa2   : > { %2943 = vmatpush3.bf16.msra.mxu1 %v3231_v16 }
  0xa3   : > { %v616_v17 = vpop.permute.xlu0 %615 }
  0xa4   : > { %v618_v18 = vpop.permute.xlu1 %617  ;;  %628 = vst.msk [vmem:[#allocation3] sm:$0xff] %vm627_vm7, %v616_v17 }
  0xa5   : > { %629 = vst.msk [vmem:[#allocation3 + $0x28] sm:$0xff] %vm627_vm7, %v618_v18 }
  0xa7   : > { %v649_v19 = vpop.permute.xlu0 %648 }
  0xa8   : > { %v651_v20 = vpop.permute.xlu1 %650  ;;  %661 = vst.msk [vmem:[#allocation3] sm:$0xff] %vm660_vm8, %v649_v19 }
  0xa9   : > { %662 = vst.msk [vmem:[#allocation3 + $0x28] sm:$0xff] %vm660_vm8, %v651_v20 }
  0xab   : > { %v682_v21 = vpop.permute.xlu0 %681 }
  0xac   : > { %v684_v22 = vpop.permute.xlu1 %683  ;;  %694 = vst.msk [vmem:[#allocation3] sm:$0xff] %vm693_vm9, %v682_v21 }
  0xad   : > { %695 = vst.msk [vmem:[#allocation3 + $0x28] sm:$0xff] %vm693_vm9, %v684_v22 }
  0xaf   : > { %v716_v23 = vpop.permute.xlu0 %715 }
  0xb0   : > { %v718_v24 = vpop.permute.xlu1 %717  ;;  %728 = vst.msk [vmem:[#allocation3] sm:$0xff] %vm727_vm10, %v716_v23 }
  0xb1   : > { %729 = vst.msk [vmem:[#allocation3 + $0x28] sm:$0xff] %vm727_vm10, %v718_v24 }
  0xb3   : > { %v749_v25 = vpop.permute.xlu0 %748 }
  0xb4   : > { %v751_v26 = vpop.permute.xlu1 %750  ;;  %761 = vst.msk [vmem:[#allocation3] sm:$0xff] %vm760_vm11, %v749_v25 }
  0xb5   : > { %762 = vst.msk [vmem:[#allocation3 + $0x28] sm:$0xff] %vm760_vm11, %v751_v26 }
  0xb7   : > { %v782_v27 = vpop.permute.xlu0 %781 }
  0xb8   : > { %v784_v28 = vpop.permute.xlu1 %783  ;;  %794 = vst.msk [vmem:[#allocation3] sm:$0xff] %vm793_vm12, %v782_v27 }
  0xb9   : > { %795 = vst.msk [vmem:[#allocation3 + $0x28] sm:$0xff] %vm793_vm12, %v784_v28 }
  0xbb   : > { %v554_v29 = vpop.permute.xlu0 %553 }
  0xbc   : > { %v556_v30 = vpop.permute.xlu1 %555  ;;  %564 = vst.msk [vmem:[#allocation3 + $0x50] sm:$0xff] %vm561_vm5, %v554_v29 }
  0xbd   : > { %565 = vst.msk [vmem:[#allocation3 + $0x78] sm:$0xff] %vm561_vm5, %v556_v30  ;;  %vm2703_vm5 = vcmask 516096  }
  0xbf   : > { %v587_v31 = vpop.permute.xlu0 %586  ;;  %v798_v33 = vld [vmem:[#allocation3] sm:$0xff] }
  0xc0   : > { %v589_v32 = vpop.permute.xlu1 %588  ;;  %v799_v34 = vld [vmem:[#allocation3 + $0x28] sm:$0xff]  ;;  %597 = vst.msk [vmem:[#allocation3 + $0x50] sm:$0xff] %vm594_vm6, %v587_v31  ;;  %3089 = vmatprep.mubr.msk.bf16.mxu0 %vm832_vm13, %v798_v33 }
  0xc1   : > { %598 = vst.msk [vmem:[#allocation3 + $0x78] sm:$0xff] %vm594_vm6, %v589_v32  ;;  %3090 = vmatmul.mubr.msk.bf16.vlgmr.msra.gmra.mrb[0].mxu0 %vm832_vm13, %v799_v34  ;;  %v3234_v34 = vld [vmem:[%s4257_s3 + $0x70] sm:$0xff]  }
  0xc2   : > { %3098 = vmatpush3.bf16.msra.mxu0 %v3220_v49 }
  0xc3   : > { %v620_v35 = vpop.permute.xlu0 %619  ;;  %3099 = vmatprep.subr.bf16.mxu0 %v3221_v50 }
  0xc4   : > { %v622_v36 = vpop.permute.xlu1 %621  ;;  %630 = vst.msk [vmem:[#allocation3 + $0x50] sm:$0xff] %vm627_vm7, %v620_v35 }
  0xc5   : > { %631 = vst.msk [vmem:[#allocation3 + $0x78] sm:$0xff] %vm627_vm7, %v622_v36 }
  0xc6   : > { %3100 = vmatpush3.bf16.msra.mxu0 %v3221_v50 }
  0xc7   : > { %v653_v37 = vpop.permute.xlu0 %652 }
  0xc8   : > { %v655_v38 = vpop.permute.xlu1 %654  ;;  %663 = vst.msk [vmem:[#allocation3 + $0x50] sm:$0xff] %vm660_vm8, %v653_v37 }
  0xc9   : > { %664 = vst.msk [vmem:[#allocation3 + $0x78] sm:$0xff] %vm660_vm8, %v655_v38 }
  0xcb   : > { %v686_v39 = vpop.permute.xlu0 %685 }
  0xcc   : > { %v688_v40 = vpop.permute.xlu1 %687  ;;  %696 = vst.msk [vmem:[#allocation3 + $0x50] sm:$0xff] %vm693_vm9, %v686_v39  ;;  %v3235_v39 = vld [vmem:[%s4257_s3 + $0x30] sm:$0xff]  }
  0xcd   : > { %697 = vst.msk [vmem:[#allocation3 + $0x78] sm:$0xff] %vm693_vm9, %v688_v40 }
  0xcf   : > { %v720_v41 = vpop.permute.xlu0 %719 }
  0xd0   : > { %v722_v42 = vpop.permute.xlu1 %721  ;;  %730 = vst.msk [vmem:[#allocation3 + $0x50] sm:$0xff] %vm727_vm10, %v720_v41  ;;  %v3237_v41 = vld [vmem:[%s4257_s3 + $0x38] sm:$0xff]  }
  0xd1   : > { %731 = vst.msk [vmem:[#allocation3 + $0x78] sm:$0xff] %vm727_vm10, %v722_v42 }
  0xd3   : > { %v753_v43 = vpop.permute.xlu0 %752 }
  0xd4   : > { %v755_v44 = vpop.permute.xlu1 %754  ;;  %763 = vst.msk [vmem:[#allocation3 + $0x50] sm:$0xff] %vm760_vm11, %v753_v43 }
  0xd5   : > { %764 = vst.msk [vmem:[#allocation3 + $0x78] sm:$0xff] %vm760_vm11, %v755_v44 }
  0xd7   : > { %v786_v45 = vpop.permute.xlu0 %785 }
  0xd8   : > { %v788_v46 = vpop.permute.xlu1 %787  ;;  %796 = vst.msk [vmem:[#allocation3 + $0x50] sm:$0xff] %vm793_vm12, %v786_v45 }
  0xd9   : > { %797 = vst.msk [vmem:[#allocation3 + $0x78] sm:$0xff] %vm793_vm12, %v788_v46 }
  0xdf   : > { %v800_v47 = vld [vmem:[#allocation3 + $0x50] sm:$0xff] }
  0xe0   : > { %v801_v48 = vld [vmem:[#allocation3 + $0x78] sm:$0xff]  ;;  %3093 = vmatprep.mubr.msk.bf16.mxu0 %vm832_vm13, %v800_v47 }
  0xe1   : > { %3094 = vmatmul.mubr.msk.bf16.gmra.mrb[4].mxu0 %vm832_vm13, %v801_v48 }
 0x194   : > { %v3091_v58 = vpop.f32.mrb[0].mxu0 }
 0x195   : > { %v895_v59 = vadd.f32 %v3091_v58, %v3714_v57  ;;  %v886_v60 = vpop.f32.mrb[1].mxu0 }
 0x196   : > { %v887_v61 = vadd.f32 %v3714_v57, %v886_v60  ;;  %v3092_v62 = vpop.f32.mrb[2].mxu0 }
 0x197   : > { %v919_v63 = vmax.f32 %v895_v59, 0.0  ;;  %v898_v1 = vadd.f32 %v3092_v62, %v3714_v57  ;;  %v889_v2 = vpop.f32.mrb[3].mxu0 }
 0x198   : > { %v917_v3 = vmax.f32 %v887_v61, 0.0  ;;  %v890_v5 = vadd.f32 %v3714_v57, %v889_v2 }
 0x199   : > { %v920_v13 = vmax.f32 %v898_v1, 0.0  ;;  %928 = vst.msk [vmem:[#allocation2 + $0x31] sm:$0xff] %vm925_vm14, %v919_v63 }
 0x19a   : > { %v918_v14 = vmax.f32 %v890_v5, 0.0  ;;  %926 = vst.msk [vmem:[#allocation2 + $0x11] sm:$0xff] %vm925_vm14, %v917_v3 }
 0x19b   : > { %929 = vst.msk [vmem:[#allocation2 + $0x41] sm:$0xff] %vm925_vm14, %v920_v13 }
 0x19c   : > { %927 = vst.msk [vmem:[#allocation2 + $0x21] sm:$0xff] %vm925_vm14, %v918_v14 }
 0x1a0   : > { %v1067_v17 = vld [vmem:[#allocation2 + $0x32] sm:$0xff] }
 0x1a1   : > { %v951_v18 = vld [vmem:[#allocation2 + $0x11] sm:$0xff] }
 0x1a2   : > { %v1018_v19 = vld [vmem:[#allocation2 + $0x30] sm:$0xff]  ;;  %v958_v22 = vpack.c.bf16 %v951_v18, %v3571_v9  ;;  %v3737_v23 = vld [vmem:[#allocation2 + $0x42] sm:$0xff] }
 0x1a3   : > { %v1016_v20 = vld [vmem:[#allocation2 + $0x10] sm:$0xff]  ;;  %v3739_v25 = vld [vmem:[#allocation2 + $0x41] sm:$0xff]  ;;  %v1074_v27 = vpack.c.bf16 %v3737_v23, %v1067_v17 }
 0x1a4   : > { %v1130_v21 = vld [vmem:[#allocation2 + $0x31] sm:$0xff]  ;;  %v942_v26 = vpack.c.bf16 %v1016_v20, %v3576_v11  ;;  %v1066_v28 = vld [vmem:[#allocation2 + $0x22] sm:$0xff]  ;;  %966 = vrot.lane.b32.xlu1 %v958_v22, %s3384_s0 }
 0x1a5   : > { %v984_v24 = vld [vmem:[#allocation2 + $0x12] sm:$0xff]  ;;  %v1097_v29 = vld [vmem:[#allocation2 + $0x20] sm:$0xff]  ;;  %v1058_v31 = vpack.c.bf16 %v3739_v25, %v1130_v21  ;;  %v1169_v33 = vpack.c.bf16 %v1067_v17, %v1066_v28  ;;  %v3232_v9 = vld [vmem:[%s4257_s3 + $0x68] sm:$0xff]   ;;  %1083 = vrot.lane.b32.xlu0 %v1074_v27, %s3384_s0 }
 0x1a6   : > { %v1129_v30 = vld [vmem:[#allocation2 + $0x21] sm:$0xff]  ;;  %v1105_v32 = vpack.c.bf16 %v1018_v19, %v1097_v29  ;;  %946 = vst.msk [vmem:[#allocation3] sm:$0xff] %vm925_vm14, %v942_v26  ;;  %v991_v36 = vpack.c.bf16 %v984_v24, %v3573_v10  ;;  %2944 = vmatprep.subr.bf16.mxu1 %v3232_v9  ;;  %v1073_v37 = vpack.c.bf16 %v1066_v28, %v984_v24  ;;  %v3236_v10 = vld [vmem:[%s4257_s3 + $0x78] sm:$0xff]  }
 0x1a7   : > { %v3233_v11 = vld [vmem:[%s4257_s3 + $0x28] sm:$0xff]   ;;  %1062 = vst.msk [vmem:[#allocation3 + $0x30] sm:$0xff] %vm925_vm14, %v1058_v31  ;;  %v1057_v35 = vpack.c.bf16 %v1129_v30, %v951_v18  ;;  %1173 = vst.msk [vmem:[#allocation3 + $0x10] sm:$0xff] %vm925_vm14, %v1169_v33  ;;  %v1019_v38 = vld [vmem:[#allocation2 + $0x40] sm:$0xff]  ;;  %v1024_v43 = vpack.c.bf16 %v1097_v29, %v1016_v20  ;;  %v1137_v44 = vpack.c.bf16 %v1130_v21, %v1129_v30 }
 0x1a8   : > { %947 = vst.msk [vmem:[#allocation3 + $0x28] sm:$0xff] %vm925_vm14, %v1105_v32  ;;  %2945 = vmatpush3.bf16.msra.mxu1 %v3233_v11  ;;  %999 = vrot.lane.b32.xlu1 %v991_v36, %s4280_s18  ;;  %v1025_v40 = vpack.c.bf16 %v1019_v38, %v1018_v19 }
 0x1a9   : > { %1061 = vst.msk [vmem:[#allocation3 + $0x8] sm:$0xff] %vm925_vm14, %v1057_v35  ;;  %2946 = vmatprep.subr.bf16.mxu1 %v3234_v34  ;;  %1081 = vrot.lane.b32.xlu0 %v1073_v37, %s3384_s0 }
 0x1ac   : > { %2947 = vmatpush3.bf16.msra.mxu1 %v3235_v39  ;;  %1034 = vrot.lane.b32.xlu1 %v1025_v40, %s3386_s21 }
 0x1ad   : > { %2948 = vmatprep.subr.bf16.mxu1 %v3236_v10  ;;  %1113 = vrot.lane.b32.xlu0 %v1105_v32, %s4280_s18 }
 0x1ae   : > { %v1179_v42 = vld [vmem:[#allocation3 + $0x10] sm:$0xff] }
 0x1af   : > { %3101 = vmatprep.mubr.msk.bf16.mxu0 %vm925_vm14, %v1179_v42 }
 0x1b0   : > { %2949 = vmatpush3.bf16.msra.mxu1 %v3237_v41  ;;  %1032 = vrot.lane.b32.xlu1 %v1024_v43, %s3386_s21 }
 0x1b1   : > { %1145 = vrot.lane.b32.xlu0 %v1137_v44, %s3386_s21 }
 0x1b4   : > { %v3095_v45 = vpop.f32.mrb[4].mxu0  ;;  %968 = vrot.lane.b32.xlu1 %v1137_v44, %s3384_s0 }
 0x1b5   : > { %v911_v46 = vadd.f32 %v3095_v45, %v3714_v57  ;;  %v902_v47 = vpop.f32.mrb[5].mxu0 }
 0x1b6   : > { %v903_v48 = vadd.f32 %v3714_v57, %v902_v47  ;;  %v3096_v49 = vpop.f32.mrb[6].mxu0 }
 0x1b7   : > { %v923_v50 = vmax.f32 %v911_v46, 0.0  ;;  %v914_v51 = vadd.f32 %v3096_v49, %v3714_v57  ;;  %v905_v52 = vpop.f32.mrb[7].mxu0 }
 0x1b8   : > { %v921_v53 = vmax.f32 %v903_v48, 0.0  ;;  %v906_v54 = vadd.f32 %v3714_v57, %v905_v52  ;;  %1001 = vrot.lane.b32.xlu1 %v1169_v33, %s4280_s18 }
 0x1b9   : > { %932 = vst.msk [vmem:[#allocation2 + $0x71] sm:$0xff] %vm925_vm14, %v923_v50  ;;  %v924_v55 = vmax.f32 %v914_v51, 0.0 }
 0x1ba   : > { %930 = vst.msk [vmem:[#allocation2 + $0x51] sm:$0xff] %vm925_vm14, %v921_v53  ;;  %v922_v56 = vmax.f32 %v906_v54, 0.0 }
 0x1bb   : > { %933 = vst.msk [vmem:[#allocation2 + $0x81] sm:$0xff] %vm925_vm14, %v924_v55 }
 0x1bc   : > { %931 = vst.msk [vmem:[#allocation2 + $0x61] sm:$0xff] %vm925_vm14, %v922_v56 }
 0x1c0   : > { %v1071_v63 = vld [vmem:[#allocation2 + $0x72] sm:$0xff] }
 0x1c1   : > { %v1100_v58 = vld [vmem:[#allocation2 + $0x50] sm:$0xff] }
 0x1c2   : > { %v955_v59 = vld [vmem:[#allocation2 + $0x51] sm:$0xff]  ;;  %v1106_v61 = vpack.c.bf16 %v1100_v58, %v1019_v38  ;;  %v1072_v1 = vld [vmem:[#allocation2 + $0x82] sm:$0xff] }
 0x1c3   : > { %v988_v60 = vld [vmem:[#allocation2 + $0x52] sm:$0xff]  ;;  %v960_v62 = vpack.c.bf16 %v955_v59, %v3739_v25  ;;  %v1135_v2 = vld [vmem:[#allocation2 + $0x81] sm:$0xff]  ;;  %v1172_v12 = vpack.c.bf16 %v3644_v8, %v1072_v1  ;;  %v1076_v8 = vpack.c.bf16 %v1072_v1, %v1071_v63 }
 0x1c4   : > { %v993_v57 = vpack.c.bf16 %v988_v60, %v3737_v23  ;;  %v1021_v3 = vld [vmem:[#allocation2 + $0x60] sm:$0xff]  ;;  %1115 = vrot.lane.b32.xlu0 %v1106_v61, %s4280_s18  ;;  %v957_v14 = vld [vmem:[#allocation2 + $0x71] sm:$0xff]  ;;  %948 = vst.msk [vmem:[#allocation3 + $0x50] sm:$0xff] %vm925_vm14, %v1106_v61  ;;  %v1140_v28 = vpack.c.bf16 %v3638_v6, %v1135_v2 }
 0x1c5   : > { %v1165_v5 = vld [vmem:[#allocation2 + $0x62] sm:$0xff]  ;;  %970 = vrot.lane.b32.xlu1 %v960_v62, %s3384_s0  ;;  %v1102_v15 = vld [vmem:[#allocation2 + $0x70] sm:$0xff]  ;;  %1176 = vst.msk [vmem:[#allocation3 + $0x88] sm:$0xff] %vm925_vm14, %v1172_v12  ;;  %v1060_v17 = vpack.c.bf16 %v1135_v2, %v957_v14  ;;  %v1026_v20 = vpack.c.bf16 %v1021_v3, %v1100_v58 }
 0x1c6   : > { %v956_v7 = vld [vmem:[#allocation2 + $0x61] sm:$0xff]  ;;  %1174 = vst.msk [vmem:[#allocation3 + $0x38] sm:$0xff] %vm925_vm14, %v993_v57  ;;  %v1171_v13 = vpack.c.bf16 %v1071_v63, %v1165_v5  ;;  %v1107_v16 = vpack.c.bf16 %v1102_v15, %v1021_v3  ;;  %v1075_v22 = vpack.c.bf16 %v1165_v5, %v988_v60  ;;  %v3243_v12 = vld [vmem:[%s4259_s5 + $0x10] sm:$0xff]  }
 0x1c7   : > { %v1059_v18 = vpack.c.bf16 %v956_v7, %v955_v59  ;;  %1064 = vst.msk [vmem:[#allocation3 + $0x80] sm:$0xff] %vm925_vm14, %v1060_v17  ;;  %v961_v23 = vpack.c.bf16 %v957_v14, %v956_v7  ;;  %v1023_v25 = vld [vmem:[#allocation2 + $0x80] sm:$0xff]  ;;  %v3240_v3 = vld [vmem:[%s4259_s5 + $0x48] sm:$0xff]   ;;  %v3242_v7 = vld [vmem:[%s4259_s5 + $0x50] sm:$0xff]  }
 0x1c8   : > { %1175 = vst.msk [vmem:[#allocation3 + $0x60] sm:$0xff] %vm925_vm14, %v1171_v13  ;;  %949 = vst.msk [vmem:[#allocation3 + $0x78] sm:$0xff] %vm925_vm14, %v1107_v16  ;;  %1147 = vrot.lane.b32.xlu0 %v960_v62, %s3386_s21  ;;  %v1027_v26 = vpack.c.bf16 %v1023_v25, %v1102_v15  ;;  %v1108_v27 = vpack.c.bf16 %v3633_v4, %v1023_v25  ;;  %v3238_v1 = vld [vmem:[%s4259_s5 + $0x40] sm:$0xff]   ;;  %v3241_v5 = vld [vmem:[%s4259_s5 + $0x8] sm:$0xff]  }
 0x1c9   : > { %1003 = vrot.lane.b32.xlu1 %v993_v57, %s4280_s18  ;;  %1063 = vst.msk [vmem:[#allocation3 + $0x58] sm:$0xff] %vm925_vm14, %v1059_v18  ;;  %v3239_v2 = vld [vmem:[%s4259_s5] sm:$0xff]   ;;  %2980 = vmatprep.subr.bf16.mxu0 %v3238_v1  ;;  %v3245_v14 = vld [vmem:[%s4259_s5 + $0x18] sm:$0xff]   ;;  %v3248_v17 = vld [vmem:[%s4259_s5 + $0x68] sm:$0xff]  }
 0x1ca   : > { %v3246_v15 = vld [vmem:[%s4259_s5 + $0x60] sm:$0xff]  }
 0x1cc   : > { %1087 = vrot.lane.b32.xlu0 %v1076_v8, %s3384_s0  ;;  %v1188_v24 = vld [vmem:[#allocation3 + $0x88] sm:$0xff]  ;;  %v3888_v8 = vld [vmem:[%s4258_s4] ss:$0 sm:$0xff] }
 0x1cd   : > { %v1182_v19 = vld [vmem:[#allocation3 + $0x38] sm:$0xff]  ;;  %1036 = vrot.lane.b32.xlu1 %v1026_v20, %s3386_s21 }
 0x1ce   : > { %3102 = vmatmul.mubr.msk.bf16.vlgmr.msra.gmra.mrb[8].mxu0 %vm925_vm14, %v1182_v19 }
 0x1cf   : > { %v1185_v21 = vld [vmem:[#allocation3 + $0x60] sm:$0xff]  ;;  %2981 = vmatpush3.bf16.msra.mxu0 %v3239_v2 }
 0x1d0   : > { %3105 = vmatprep.mubr.msk.bf16.mxu0 %vm925_vm14, %v1185_v21  ;;  %1085 = vrot.lane.b32.xlu0 %v1075_v22, %s3384_s0 }
 0x1d1   : > { %972 = vrot.lane.b32.xlu1 %v961_v23, %s3384_s0  ;;  %2982 = vmatprep.subr.bf16.mxu0 %v3240_v3  ;;  %s2718_s0 = scalar_lea.sflag [#allocation5], %s459_s25 }
 0x1d3   : > { %2983 = vmatpush3.bf16.msra.mxu0 %v3241_v5 }
 0x1d4   : > { %1117 = vrot.lane.b32.xlu0 %v1107_v16, %s4280_s18  ;;  %2984 = vmatprep.subr.bf16.mxu0 %v3242_v7  ;;  %v3247_v16 = vld [vmem:[%s4259_s5 + $0x20] sm:$0xff]  }
 0x1d5   : > { %1005 = vrot.lane.b32.xlu1 %v1171_v13, %s4280_s18  ;;  %v3244_v13 = vld [vmem:[%s4259_s5 + $0x58] sm:$0xff]  }
 0x1d6   : > { %3106 = vmatmul.mubr.msk.bf16.gmra.mrb[12].mxu0 %vm925_vm14, %v1188_v24 }
 0x1d7   : > { %2985 = vmatpush3.bf16.msra.mxu0 %v3243_v12 }
 0x1d8   : > { %1149 = vrot.lane.b32.xlu0 %v961_v23, %s3386_s21  ;;  %2986 = vmatprep.subr.bf16.mxu0 %v3244_v13 }
 0x1d9   : > { %1038 = vrot.lane.b32.xlu1 %v1027_v26, %s3386_s21 }
 0x1db   : > { %2987 = vmatpush3.bf16.msra.mxu0 %v3245_v14 }
 0x1dc   : > { %1119 = vrot.lane.b32.xlu0 %v1108_v27, %s4280_s18  ;;  %2988 = vmatprep.subr.bf16.mxu0 %v3246_v15  ;;  %v3249_v27 = vld [vmem:[%s4259_s5 + $0x28] sm:$0xff]  }
 0x1dd   : > { %v3256_v15 = vld [vmem:[%s4259_s5 + $0xc8] sm:$0xff]  }
 0x1df   : > { %2989 = vmatpush3.bf16.msra.mxu0 %v3247_v16  ;;  %v3943_v16 = vld [vmem:[%s4259_s5 + $0x100] sm:$0xff]  }
 0x1e0   : > { %1151 = vrot.lane.b32.xlu0 %v1140_v28, %s3386_s21  ;;  %2990 = vmatprep.subr.bf16.mxu0 %v3248_v17  ;;  %v3258_v17 = vld [vmem:[%s4259_s5 + $0x88] sm:$0xff]  }
 0x1e3   : > { %2991 = vmatpush3.bf16.msra.mxu0 %v3249_v27 }
 0x216   : > { %v967_v29 = vpop.permute.xlu1 %966 }
 0x217   : > { %979 = vst.msk [vmem:[#allocation3] sm:$0xff] %vm978_vm15, %v967_v29  ;;  %v1084_v30 = vpop.permute.xlu0 %1083 }
 0x218   : > { %1094 = vst.msk [vmem:[#allocation3 + $0x30] sm:$0xff] %vm978_vm15, %v1084_v30  ;;  %v3250_v30 = vld [vmem:[%s4259_s5 + $0x70] sm:$0xff]  }
 0x219   : > { %2992 = vmatprep.subr.bf16.mxu0 %v3250_v30 }
 0x21a   : > { %v1000_v31 = vpop.permute.xlu1 %999 }
 0x21b   : > { %1012 = vst.msk [vmem:[#allocation3] sm:$0xff] %vm1011_vm1, %v1000_v31  ;;  %v1082_v32 = vpop.permute.xlu0 %1081  ;;  %v3251_v31 = vld [vmem:[%s4259_s5 + $0x30] sm:$0xff]  }
 0x21c   : > { %1093 = vst.msk [vmem:[#allocation3 + $0x8] sm:$0xff] %vm978_vm15, %v1082_v32  ;;  %2993 = vmatpush3.bf16.msra.mxu0 %v3251_v31 }
 0x21e   : > { %v1035_v4 = vpop.permute.xlu1 %1034 }
 0x21f   : > { %v1114_v33 = vpop.permute.xlu0 %1113 }
 0x220   : > { %1125 = vst.msk [vmem:[#allocation3 + $0x8] sm:$0xff] %vm1011_vm1, %v1114_v33  ;;  %v3253_v33 = vld [vmem:[%s4259_s5 + $0x38] sm:$0xff]  }
 0x222   : > { %v1033_v6 = vpop.permute.xlu1 %1032 }
 0x223   : > { %1045 = vst.msk [vmem:[#allocation3] sm:$0xff] %vm1044_vm2, %v1033_v6  ;;  %v1146_v9 = vpop.permute.xlu0 %1145  ;;  %v1514_v6 = vld [vmem:[#allocation2 + $0x1] sm:$0xff] }
 0x224   : > { %1157 = vst.msk [vmem:[#allocation3 + $0x8] sm:$0xff] %vm1044_vm2, %v1146_v9  ;;  %v1498_v9 = vld [vmem:[#allocation2] sm:$0xff] }
 0x226   : > { %v969_v11 = vpop.permute.xlu1 %968 }
 0x227   : > { %980 = vst.msk [vmem:[#allocation3 + $0x28] sm:$0xff] %vm978_vm15, %v969_v11  ;;  %v1547_v11 = vld [vmem:[#allocation2 + $0x2] sm:$0xff] }
 0x22a   : > { %v1002_v34 = vpop.permute.xlu1 %1001  ;;  %v1177_v36 = vld [vmem:[#allocation3] sm:$0xff] }
 0x22b   : > { %1013 = vst.msk [vmem:[#allocation3 + $0x28] sm:$0xff] %vm1011_vm1, %v1002_v34  ;;  %v1178_v35 = vld [vmem:[#allocation3 + $0x8] sm:$0xff] }
 0x22c   : > { %1046 = vst.msk [vmem:[#allocation3 + $0x28] sm:$0xff] %vm1044_vm2, %v1035_v4  ;;  %1384 = vmatprep.mubr.bf16.mxu1 %v1178_v35  ;;  %v3252_v4 = vld [vmem:[%s4259_s5 + $0x78] sm:$0xff]  }
 0x22d   : > { %1385 = vmatmul.mubr.bf16.vlgmr.msra.gmra.mrb[0].mxu1 %v1177_v36  ;;  %2994 = vmatprep.subr.bf16.mxu0 %v3252_v4 }
 0x22e   : > { %2995 = vmatpush3.bf16.msra.mxu0 %v3253_v33 }
 0x22f   : > { %3109 = vmatprep.subr.bf16.mxu0 %v3943_v16 }
 0x233   : > { %v1180_v45 = vld [vmem:[#allocation3 + $0x28] sm:$0xff] }
 0x236   : > { %v1116_v37 = vpop.permute.xlu0 %1115 }
 0x237   : > { %v971_v38 = vpop.permute.xlu1 %970  ;;  %1126 = vst.msk [vmem:[#allocation3 + $0x30] sm:$0xff] %vm1011_vm1, %v1116_v37 }
 0x238   : > { %981 = vst.msk [vmem:[#allocation3 + $0x50] sm:$0xff] %vm978_vm15, %v971_v38 }
 0x23a   : > { %v1148_v39 = vpop.permute.xlu0 %1147 }
 0x23b   : > { %v1004_v10 = vpop.permute.xlu1 %1003  ;;  %1158 = vst.msk [vmem:[#allocation3 + $0x30] sm:$0xff] %vm1044_vm2, %v1148_v39 }
 0x23c   : > { %1014 = vst.msk [vmem:[#allocation3 + $0x50] sm:$0xff] %vm1011_vm1, %v1004_v10 }
 0x23e   : > { %v1088_v40 = vpop.permute.xlu0 %1087 }
 0x23f   : > { %1096 = vst.msk [vmem:[#allocation3 + $0x80] sm:$0xff] %vm978_vm15, %v1088_v40  ;;  %v1037_v41 = vpop.permute.xlu1 %1036 }
 0x240   : > { %1047 = vst.msk [vmem:[#allocation3 + $0x50] sm:$0xff] %vm1044_vm2, %v1037_v41 }
 0x242   : > { %v1086_v42 = vpop.permute.xlu0 %1085  ;;  %v1181_v43 = vld [vmem:[#allocation3 + $0x30] sm:$0xff] }
 0x243   : > { %1095 = vst.msk [vmem:[#allocation3 + $0x58] sm:$0xff] %vm978_vm15, %v1086_v42  ;;  %v973_v44 = vpop.permute.xlu1 %972  ;;  %1392 = vmatprep.mubr.bf16.mxu1 %v1181_v43 }
 0x244   : > { %982 = vst.msk [vmem:[#allocation3 + $0x78] sm:$0xff] %vm978_vm15, %v973_v44  ;;  %1393 = vmatmul.mubr.bf16.gmra.mrb[4].mxu1 %v1180_v45 }
 0x246   : > { %v1118_v46 = vpop.permute.xlu0 %1117 }
 0x247   : > { %1127 = vst.msk [vmem:[#allocation3 + $0x58] sm:$0xff] %vm1011_vm1, %v1118_v46  ;;  %v1006_v47 = vpop.permute.xlu1 %1005  ;;  %v1183_v53 = vld [vmem:[#allocation3 + $0x50] sm:$0xff] }
 0x248   : > { %1015 = vst.msk [vmem:[#allocation3 + $0x78] sm:$0xff] %vm1011_vm1, %v1006_v47 }
 0x24a   : > { %v1150_v48 = vpop.permute.xlu0 %1149 }
 0x24b   : > { %1159 = vst.msk [vmem:[#allocation3 + $0x58] sm:$0xff] %vm1044_vm2, %v1150_v48  ;;  %v1039_v49 = vpop.permute.xlu1 %1038 }
 0x24c   : > { %1048 = vst.msk [vmem:[#allocation3 + $0x78] sm:$0xff] %vm1044_vm2, %v1039_v49 }
 0x24e   : > { %v1120_v50 = vpop.permute.xlu0 %1119 }
 0x24f   : > { %1128 = vst.msk [vmem:[#allocation3 + $0x80] sm:$0xff] %vm1011_vm1, %v1120_v50 }
 0x252   : > { %v1152_v51 = vpop.permute.xlu0 %1151  ;;  %v1184_v52 = vld [vmem:[#allocation3 + $0x58] sm:$0xff] }
 0x253   : > { %1160 = vst.msk [vmem:[#allocation3 + $0x80] sm:$0xff] %vm1044_vm2, %v1152_v51  ;;  %1400 = vmatprep.mubr.bf16.mxu1 %v1184_v52  ;;  %v1186_v55 = vld [vmem:[#allocation3 + $0x78] sm:$0xff] }
 0x254   : > { %1401 = vmatmul.mubr.bf16.gmra.mrb[8].mxu1 %v1183_v53 }
 0x25a   : > { %v1187_v54 = vld [vmem:[#allocation3 + $0x80] sm:$0xff] }
 0x25b   : > { %1408 = vmatprep.mubr.bf16.mxu1 %v1187_v54  ;;  %v3254_v54 = vld [vmem:[%s4259_s5 + $0xc0] sm:$0xff]  }
 0x25c   : > { %1409 = vmatmul.mubr.bf16.gmra.mrb[12].mxu1 %v1186_v55  ;;  %v3255_v55 = vld [vmem:[%s4259_s5 + $0x80] sm:$0xff]   ;;  %3020 = vmatprep.subr.bf16.mxu1 %v3254_v54 }
 0x25d   : > { %3021 = vmatpush3.bf16.msra.mxu1 %v3255_v55 }
 0x25e   : > { %3022 = vmatprep.subr.bf16.mxu1 %v3256_v15 }
 0x261   : > { %3023 = vmatpush3.bf16.msra.mxu1 %v3258_v17 }
 0x2a1   : > { %v3840_v56 = vpop.f32.mrb[8].mxu0 }
 0x2a2   : > { %v1451_v58 = vpop.f32.mrb[9].mxu0 }
 0x2a3   : > { %v3842_v59 = vpop.f32.mrb[10].mxu0 }
 0x2a4   : > { %v1454_v60 = vpop.f32.mrb[11].mxu0 }
 0x2a9   : > { %v3844_v61 = vpop.f32.mrb[12].mxu0 }
 0x2aa   : > { %v3846_v62 = vpop.f32.mrb[13].mxu0 }
 0x2ab   : > { %v3848_v57 = vpop.f32.mrb[14].mxu0 }
 0x2ac   : > { %v3850_v63 = vpop.f32.mrb[15].mxu0 }
 0x300   : > { %v2950_v18 = vpop.f32.mrb[0].mxu1 }
 0x301   : > { %v2951_v19 = vpop.f32.mrb[1].mxu1 }
 0x302   : > { %v2952_v20 = vadd.f32 %v2951_v19, %v2950_v18  ;;  %v2953_v21 = vpop.f32.mrb[2].mxu1 }
 0x303   : > { %v2954_v22 = vpop.f32.mrb[3].mxu1 }
 0x304   : > { %v1387_v23 = vadd.f32 %v2952_v20, %v3888_v8  ;;  %v2955_v24 = vadd.f32 %v2954_v22, %v2953_v21 }
 0x306   : > { %v1452_v25 = vadd.f32 %v1451_v58, %v1387_v23  ;;  %v1390_v26 = vadd.f32 %v2955_v24, %v3888_v8  ;;  %v3259_v24 = vld [vmem:[%s4259_s5 + $0xd0] sm:$0xff]  }
 0x307   : > { %3024 = vmatprep.subr.bf16.mxu1 %v3259_v24 }
 0x308   : > { %v1482_v28 = vmax.f32 %v1452_v25, 0.0  ;;  %v1455_v29 = vadd.f32 %v1454_v60, %v1390_v26 }
 0x30a   : > { %1490 = vst.msk [vmem:[#allocation2 + $0x11] sm:$0xff] %vm477_vm0, %v1482_v28  ;;  %v1483_v32 = vmax.f32 %v1455_v29, 0.0  ;;  %v3260_v28 = vld [vmem:[%s4259_s5 + $0x90] sm:$0xff]  }
 0x30b   : > { %3025 = vmatpush3.bf16.msra.mxu1 %v3260_v28  ;;  %v3262_v28 = vld [vmem:[%s4259_s5 + $0x108] sm:$0xff]  }
 0x30c   : > { %1491 = vst.msk [vmem:[#allocation2 + $0x21] sm:$0xff] %vm477_vm0, %v1483_v32 }
 0x311   : > { %v1515_v34 = vld [vmem:[#allocation2 + $0x11] sm:$0xff] }
 0x312   : > { %v1563_v35 = vld [vmem:[#allocation2 + $0x10] sm:$0xff]  ;;  %v1522_v37 = vpack.c.bf16 %v1515_v34, %v1514_v6 }
 0x313   : > { %v3909_v36 = vld [vmem:[#allocation2 + $0x12] sm:$0xff]  ;;  %v1506_v38 = vpack.c.bf16 %v1563_v35, %v1498_v9  ;;  %v1564_v10 = vld [vmem:[#allocation2 + $0x20] sm:$0xff] }
 0x314   : > { %v1555_v39 = vpack.c.bf16 %v3909_v36, %v1547_v11  ;;  %v1516_v40 = vld [vmem:[#allocation2 + $0x21] sm:$0xff]  ;;  %1530 = vrot.lane.b32.xlu1 %v1522_v37, %s4297_s1  ;;  %v1571_v41 = vpack.c.bf16 %v1564_v10, %v1563_v35  ;;  %v3263_v9 = vld [vmem:[%s4259_s5 + $0x98] sm:$0xff]  }
 0x315   : > { %1510 = vst.msk [vmem:[#allocation3] sm:$0xff] %vm477_vm0, %v1506_v38  ;;  %v1603_v42 = vpack.c.bf16 %v1516_v40, %v1515_v34  ;;  %v3929_v60 = vld [vmem:[#allocation2 + $0x22] sm:$0xff] }
 0x316   : > { %1559 = vst.msk [vmem:[#allocation3 + $0x8] sm:$0xff] %vm477_vm0, %v1555_v39  ;;  %1579 = vrot.lane.b32.xlu0 %v1571_v41, %s4297_s1  ;;  %v3265_v39 = vld [vmem:[%s4259_s5 + $0xa0] sm:$0xff]  }
 0x317   : > { %1607 = vst.msk [vmem:[#allocation3 + $0x10] sm:$0xff] %vm477_vm0, %v1603_v42  ;;  %v2956_v43 = vpop.f32.mrb[4].mxu1 }
 0x318   : > { %v2957_v44 = vpop.f32.mrb[5].mxu1 }
 0x319   : > { %v2958_v45 = vadd.f32 %v2957_v44, %v2956_v43  ;;  %v2959_v46 = vpop.f32.mrb[6].mxu1 }
 0x31a   : > { %v2960_v47 = vpop.f32.mrb[7].mxu1 }
 0x31b   : > { %v1395_v48 = vadd.f32 %v2958_v45, %v3888_v8  ;;  %v2961_v49 = vadd.f32 %v2960_v47, %v2959_v46  ;;  %v3266_v47 = vld [vmem:[%s4259_s5 + $0xe8] sm:$0xff]  }
 0x31d   : > { %v1460_v50 = vadd.f32 %v3840_v56, %v1395_v48  ;;  %v1398_v51 = vadd.f32 %v2961_v49, %v3888_v8 }
 0x31f   : > { %v1484_v52 = vmax.f32 %v1460_v50, 0.0  ;;  %v1463_v53 = vadd.f32 %v3842_v59, %v1398_v51  ;;  %v3268_v50 = vld [vmem:[%s4259_s5 + $0xa8] sm:$0xff]  }
 0x321   : > { %1492 = vst.msk [vmem:[#allocation2 + $0x31] sm:$0xff] %vm477_vm0, %v1484_v52  ;;  %v1485_v58 = vmax.f32 %v1463_v53, 0.0  ;;  %v3269_v52 = vld [vmem:[%s4259_s5 + $0xf0] sm:$0xff]  }
 0x322   : > { %v3270_v53 = vld [vmem:[%s4259_s5 + $0xb0] sm:$0xff]  }
 0x323   : > { %1493 = vst.msk [vmem:[#allocation2 + $0x41] sm:$0xff] %vm477_vm0, %v1485_v58 }
 0x327   : > { %v2962_v56 = vpop.f32.mrb[8].mxu1 }
 0x328   : > { %v2963_v1 = vpop.f32.mrb[9].mxu1  ;;  %v1517_v59 = vld [vmem:[#allocation2 + $0x31] sm:$0xff] }
 0x329   : > { %v1565_v2 = vld [vmem:[#allocation2 + $0x30] sm:$0xff]  ;;  %v2964_v5 = vadd.f32 %v2963_v1, %v2962_v56  ;;  %v2965_v7 = vpop.f32.mrb[10].mxu1  ;;  %v3933_v12 = vpack.c.bf16 %v1517_v59, %v1516_v40 }
 0x32a   : > { %v3931_v3 = vld [vmem:[#allocation2 + $0x32] sm:$0xff]  ;;  %v1507_v13 = vpack.c.bf16 %v1565_v2, %v1564_v10  ;;  %v2966_v18 = vpop.f32.mrb[11].mxu1  ;;  %v1566_v19 = vld [vmem:[#allocation2 + $0x40] sm:$0xff] }
 0x32b   : > { %v1556_v14 = vpack.c.bf16 %v3931_v3, %v3929_v60  ;;  %v1518_v20 = vld [vmem:[#allocation2 + $0x41] sm:$0xff]  ;;  %v1403_v21 = vadd.f32 %v2964_v5, %v3888_v8  ;;  %v2967_v22 = vadd.f32 %v2966_v18, %v2965_v7  ;;  %1532 = vrot.lane.b32.xlu1 %v3933_v12, %s4297_s1  ;;  %v1572_v23 = vpack.c.bf16 %v1566_v19, %v1565_v2  ;;  %v3271_v5 = vld [vmem:[%s4259_s5 + $0xf8] sm:$0xff]   ;;  %v1650_v7 = vld [vmem:[#allocation2 + $0x90] sm:$0xff] }
 0x32c   : > { %1511 = vst.msk [vmem:[#allocation3 + $0x28] sm:$0xff] %vm477_vm0, %v1507_v13  ;;  %1655 = vst.msk [vmem:[#allocation3 + $0x18] sm:$0xff] %vm477_vm0, %v1507_v13  ;;  %v1604_v25 = vpack.c.bf16 %v1518_v20, %v1517_v59  ;;  %v3985_v41 = vld [vmem:[#allocation2 + $0x42] sm:$0xff]  ;;  %v1698_v13 = vld [vmem:[#allocation2 + $0x92] sm:$0xff] }
 0x32d   : > { %1560 = vst.msk [vmem:[#allocation3 + $0x30] sm:$0xff] %vm477_vm0, %v1556_v14  ;;  %1703 = vst.msk [vmem:[#allocation3 + $0x20] sm:$0xff] %vm477_vm0, %v1556_v14  ;;  %v1468_v26 = vadd.f32 %v3846_v62, %v1403_v21  ;;  %v1406_v27 = vadd.f32 %v2967_v22, %v3888_v8  ;;  %1581 = vrot.lane.b32.xlu0 %v1572_v23, %s4297_s1  ;;  %v3261_v62 = vld [vmem:[%s4259_s5 + $0xd8] sm:$0xff]   ;;  %v1619_v23 = vpack.c.bf16 %v3929_v60, %v3909_v36 }
 0x32e   : > { %1608 = vst.msk [vmem:[#allocation3 + $0x38] sm:$0xff] %vm477_vm0, %v1604_v25  ;;  %3026 = vmatprep.subr.bf16.mxu1 %v3261_v62  ;;  %v1620_v24 = vpack.c.bf16 %v3985_v41, %v3931_v3  ;;  %v1666_v60 = vld [vmem:[#allocation2 + $0x91] sm:$0xff] }
 0x32f   : > { %v1486_v29 = vmax.f32 %v1468_v26, 0.0  ;;  %v1471_v30 = vadd.f32 %v3850_v63, %v1406_v27  ;;  %v2968_v31 = vpop.f32.mrb[12].mxu1  ;;  %v3264_v63 = vld [vmem:[%s4259_s5 + $0xe0] sm:$0xff]   ;;  %3027 = vmatpush3.bf16.msra.mxu1 %v3263_v9 }
 0x330   : > { %v2969_v32 = vpop.f32.mrb[13].mxu1  ;;  %3028 = vmatprep.subr.bf16.mxu1 %v3264_v63 }
 0x331   : > { %1494 = vst.msk [vmem:[#allocation2 + $0x51] sm:$0xff] %vm477_vm0, %v1486_v29  ;;  %v1487_v4 = vmax.f32 %v1471_v30, 0.0  ;;  %v2970_v33 = vadd.f32 %v2969_v32, %v2968_v31  ;;  %v2971_v6 = vpop.f32.mrb[14].mxu1  ;;  %v3267_v30 = vld [vmem:[%s4259_s5 + $0x110] sm:$0xff]   ;;  %v3272_v31 = vld [vmem:[%s4259_s5 + $0x118] sm:$0xff]  }
 0x332   : > { %v2972_v11 = vpop.f32.mrb[15].mxu1 }
 0x333   : > { %1495 = vst.msk [vmem:[#allocation2 + $0x61] sm:$0xff] %vm477_vm0, %v1487_v4  ;;  %v1411_v34 = vadd.f32 %v2970_v33, %v3888_v8  ;;  %v2973_v35 = vadd.f32 %v2972_v11, %v2971_v6  ;;  %3029 = vmatpush3.bf16.msra.mxu1 %v3265_v39 }
 0x334   : > { %3030 = vmatprep.subr.bf16.mxu1 %v3266_v47 }
 0x335   : > { %v1476_v37 = vadd.f32 %v3844_v61, %v1411_v34  ;;  %v1414_v38 = vadd.f32 %v2973_v35, %v3888_v8 }
 0x337   : > { %v1488_v10 = vmax.f32 %v1476_v37, 0.0  ;;  %v1479_v40 = vadd.f32 %v3848_v57, %v1414_v38  ;;  %3031 = vmatpush3.bf16.msra.mxu1 %v3268_v50 }
 0x338   : > { %v1519_v42 = vld [vmem:[#allocation2 + $0x51] sm:$0xff]  ;;  %3032 = vmatprep.subr.bf16.mxu1 %v3269_v52 }
 0x339   : > { %v1567_v43 = vld [vmem:[#allocation2 + $0x50] sm:$0xff]  ;;  %1496 = vst.msk [vmem:[#allocation2 + $0x71] sm:$0xff] %vm477_vm0, %v1488_v10  ;;  %v1489_v61 = vmax.f32 %v1479_v40, 0.0  ;;  %v1524_v45 = vpack.c.bf16 %v1519_v42, %v1518_v20 }
 0x33a   : > { %v3987_v44 = vld [vmem:[#allocation2 + $0x52] sm:$0xff]  ;;  %v1508_v8 = vpack.c.bf16 %v1567_v43, %v1566_v19  ;;  %v1568_v57 = vld [vmem:[#allocation2 + $0x60] sm:$0xff] }
 0x33b   : > { %v1557_v46 = vpack.c.bf16 %v3987_v44, %v3985_v41  ;;  %v1520_v48 = vld [vmem:[#allocation2 + $0x61] sm:$0xff]  ;;  %1497 = vst.msk [vmem:[#allocation2 + $0x81] sm:$0xff] %vm477_vm0, %v1489_v61  ;;  %1534 = vrot.lane.b32.xlu1 %v1524_v45, %s4297_s1  ;;  %v1573_v49 = vpack.c.bf16 %v1568_v57, %v1567_v43  ;;  %3033 = vmatpush3.bf16.msra.mxu1 %v3270_v53  ;;  %v3273_v19 = vld [vmem:[%s4259_s5 + $0xb8] sm:$0xff]  }
 0x33c   : > { %1512 = vst.msk [vmem:[#allocation3 + $0x50] sm:$0xff] %vm477_vm0, %v1508_v8  ;;  %1656 = vst.msk [vmem:[#allocation3 + $0x40] sm:$0xff] %vm477_vm0, %v1508_v8  ;;  %v1605_v51 = vpack.c.bf16 %v1520_v48, %v1519_v42  ;;  %v1616_v54 = vld [vmem:[#allocation2 + $0x62] sm:$0xff]  ;;  %3034 = vmatprep.subr.bf16.mxu1 %v3271_v5 }
 0x33d   : > { %1561 = vst.msk [vmem:[#allocation3 + $0x58] sm:$0xff] %vm477_vm0, %v1557_v46  ;;  %1704 = vst.msk [vmem:[#allocation3 + $0x48] sm:$0xff] %vm477_vm0, %v1557_v46  ;;  %1583 = vrot.lane.b32.xlu0 %v1573_v49, %s4297_s1  ;;  %v1621_v36 = vpack.c.bf16 %v1616_v54, %v3987_v44  ;;  %v1711_v42 = vld [vmem:[#allocation3 + $0x20] sm:$0xff] }
 0x33e   : > { %1609 = vst.msk [vmem:[#allocation3 + $0x60] sm:$0xff] %vm477_vm0, %v1605_v51 }
 0x33f   : > { %3035 = vmatpush3.bf16.msra.mxu1 %v3273_v19 }
 0x340   : > { %v1521_v55 = vld [vmem:[#allocation2 + $0x71] sm:$0xff]  ;;  %3125 = vmatprep.subr.bf16.mxu1 %v3374_v0 }
 0x341   : > { %v1569_v58 = vld [vmem:[#allocation2 + $0x70] sm:$0xff]  ;;  %v1525_v1 = vpack.c.bf16 %v1521_v55, %v1520_v48 }
 0x342   : > { %v1617_v56 = vld [vmem:[#allocation2 + $0x72] sm:$0xff]  ;;  %v1509_v59 = vpack.c.bf16 %v1569_v58, %v1568_v57  ;;  %v1570_v14 = vld [vmem:[#allocation2 + $0x80] sm:$0xff] }
 0x343   : > { %v1558_v2 = vpack.c.bf16 %v1617_v56, %v1616_v54  ;;  %v1618_v15 = vld [vmem:[#allocation2 + $0x82] sm:$0xff]  ;;  %1536 = vrot.lane.b32.xlu1 %v1525_v1, %s4297_s1  ;;  %v1574_v18 = vpack.c.bf16 %v1570_v14, %v1569_v58  ;;  %v1654_v21 = vpack.c.bf16 %v1650_v7, %v1570_v14  ;;  %v2242_v54 = vld [vmem:[%s4262_s8] sm:$0x3] }
 0x344   : > { %v1665_v17 = vld [vmem:[#allocation2 + $0x81] sm:$0xff]  ;;  %1513 = vst.msk [vmem:[#allocation3 + $0x78] sm:$0xff] %vm477_vm0, %v1509_v59  ;;  %1657 = vst.msk [vmem:[#allocation3 + $0x68] sm:$0xff] %vm477_vm0, %v1509_v59  ;;  %v1702_v22 = vpack.c.bf16 %v1698_v13, %v1618_v15  ;;  %v1622_v25 = vpack.c.bf16 %v1618_v15, %v1617_v56 }
 0x345   : > { %1562 = vst.msk [vmem:[#allocation3 + $0x80] sm:$0xff] %vm477_vm0, %v1558_v2  ;;  %1705 = vst.msk [vmem:[#allocation3 + $0x70] sm:$0xff] %vm477_vm0, %v1558_v2  ;;  %v1606_v20 = vpack.c.bf16 %v1665_v17, %v1521_v55  ;;  %1585 = vrot.lane.b32.xlu0 %v1574_v18, %s4297_s1  ;;  %v1670_v26 = vpack.c.bf16 %v1666_v60, %v1665_v17  ;;  %v1716_v47 = vld [vmem:[#allocation3 + $0x48] sm:$0xff]  ;;  %v3388_v55 = vmov 0   ;;  %v3275_v58 = vld [vmem:[%s4263_s9 + $0x20] sm:$0xff]  }
 0x346   : > { %1658 = vst.msk [vmem:[#allocation3 + $0x90] sm:$0xff] %vm477_vm0, %v1654_v21  ;;  %1706 = vst.msk [vmem:[#allocation3 + $0x98] sm:$0xff] %vm477_vm0, %v1702_v22  ;;  %3216 = vset.pattern.permute.xlu0 %v3388_v55  ;;  %v3277_v56 = vld [vmem:[%s4263_s9 + $0x28] sm:$0xff]  }
 0x347   : > { %1610 = vst.msk [vmem:[#allocation3 + $0x88] sm:$0xff] %vm477_vm0, %v1606_v20  ;;  %1627 = vrot.lane.b32.xlu1 %v1619_v23, %s4297_s1 }
 0x349   : > { %1675 = vrot.lane.b32.xlu0 %v3933_v12, %s4297_s1 }
 0x34b   : > { %1629 = vrot.lane.b32.xlu1 %v1620_v24, %s4297_s1 }
 0x34c   : > { %v1721_v57 = vld [vmem:[#allocation3 + $0x70] sm:$0xff] }
 0x34d   : > { %1677 = vrot.lane.b32.xlu0 %v1524_v45, %s4297_s1  ;;  %v1726_v50 = vld [vmem:[#allocation3 + $0x98] sm:$0xff] }
 0x34f   : > { %1631 = vrot.lane.b32.xlu1 %v1621_v36, %s4297_s1 }
 0x351   : > { %1679 = vrot.lane.b32.xlu0 %v1525_v1, %s4297_s1 }
 0x353   : > { %1633 = vrot.lane.b32.xlu1 %v1622_v25, %s4297_s1 }
 0x355   : > { %1681 = vrot.lane.b32.xlu0 %v1670_v26, %s4297_s1 }
 0x359   : > { %2245 = vperm.xlu0 %3216, %v2242_v54  }
 0x386   : > { %v1531_v12 = vpop.permute.xlu1 %1530 }
 0x387   : > { %1543 = vst.msk [vmem:[#allocation3] sm:$0xff] %vm1542_vm3, %v1531_v12 }
 0x388   : > { %v1580_v3 = vpop.permute.xlu0 %1579 }
 0x389   : > { %1591 = vst.msk [vmem:[#allocation3 + $0x8] sm:$0xff] %vm1542_vm3, %v1580_v3 }
 0x38e   : > { %v1707_v29 = vld [vmem:[#allocation3] sm:$0xff] }
 0x390   : > { %v1708_v27 = vld [vmem:[#allocation3 + $0x8] sm:$0xff] }
 0x391   : > { %2066 = vmatprep.mubr.bf16.mxu0 %v1708_v27  ;;  %v4092_v27 = vld [vmem:[%s4260_s6] ss:$0 sm:$0xff] }
 0x392   : > { %2067 = vmatmul.mubr.bf16.vlgmr.msra.gmra.mrb[16].mxu0 %v1707_v29 }
 0x393   : > { %3110 = vmatpush3.bf16.msra.mxu0 %v3943_v16 }
 0x394   : > { %3111 = vmatprep.subr.bf16.mxu0 %v3262_v28 }
 0x397   : > { %3112 = vmatpush3.bf16.msra.mxu0 %v3262_v28 }
 0x398   : > { %3113 = vmatprep.subr.bf16.mxu0 %v3267_v30 }
 0x39b   : > { %3114 = vmatpush3.bf16.msra.mxu0 %v3267_v30 }
 0x39c   : > { %3115 = vmatprep.subr.bf16.mxu0 %v3272_v31 }
 0x39d   : > { %v1533_v32 = vpop.permute.xlu1 %1532 }
 0x39e   : > { %1544 = vst.msk [vmem:[#allocation3 + $0x28] sm:$0xff] %vm1542_vm3, %v1533_v32 }
 0x39f   : > { %v1582_v62 = vpop.permute.xlu0 %1581  ;;  %3116 = vmatpush3.bf16.msra.mxu0 %v3272_v31 }
 0x3a0   : > { %1592 = vst.msk [vmem:[#allocation3 + $0x30] sm:$0xff] %vm1542_vm3, %v1582_v62  ;;  %3137 = vmatprep.subr.bf16.mxu0 %v3374_v0 }
 0x3a5   : > { %v1712_v4 = vld [vmem:[#allocation3 + $0x28] sm:$0xff] }
 0x3a7   : > { %v1713_v16 = vld [vmem:[#allocation3 + $0x30] sm:$0xff] }
 0x3a8   : > { %2074 = vmatprep.mubr.bf16.mxu0 %v1713_v16 }
 0x3a9   : > { %2075 = vmatmul.mubr.bf16.gmra.mrb[20].mxu0 %v1712_v4 }
 0x3ad   : > { %v1535_v33 = vpop.permute.xlu1 %1534 }
 0x3ae   : > { %1545 = vst.msk [vmem:[#allocation3 + $0x50] sm:$0xff] %vm1542_vm3, %v1535_v33 }
 0x3af   : > { %v1584_v6 = vpop.permute.xlu0 %1583 }
 0x3b0   : > { %1593 = vst.msk [vmem:[#allocation3 + $0x58] sm:$0xff] %vm1542_vm3, %v1584_v6 }
 0x3b5   : > { %v1537_v9 = vpop.permute.xlu1 %1536  ;;  %v1717_v34 = vld [vmem:[#allocation3 + $0x50] sm:$0xff] }
 0x3b6   : > { %1546 = vst.msk [vmem:[#allocation3 + $0x78] sm:$0xff] %vm1542_vm3, %v1537_v9 }
 0x3b7   : > { %v1586_v11 = vpop.permute.xlu0 %1585  ;;  %v1718_v63 = vld [vmem:[#allocation3 + $0x58] sm:$0xff] }
 0x3b8   : > { %1594 = vst.msk [vmem:[#allocation3 + $0x80] sm:$0xff] %vm1542_vm3, %v1586_v11  ;;  %2082 = vmatprep.mubr.bf16.mxu0 %v1718_v63 }
 0x3b9   : > { %v1628_v35 = vpop.permute.xlu1 %1627  ;;  %2083 = vmatmul.mubr.bf16.gmra.mrb[24].mxu0 %v1717_v34 }
 0x3ba   : > { %1639 = vst.msk [vmem:[#allocation3 + $0x10] sm:$0xff] %vm1542_vm3, %v1628_v35 }
 0x3bb   : > { %v1676_v37 = vpop.permute.xlu0 %1675 }
 0x3bc   : > { %1687 = vst.msk [vmem:[#allocation3 + $0x18] sm:$0xff] %vm1542_vm3, %v1676_v37 }
 0x3bd   : > { %v1630_v38 = vpop.permute.xlu1 %1629  ;;  %v1722_v40 = vld [vmem:[#allocation3 + $0x78] sm:$0xff] }
 0x3be   : > { %1640 = vst.msk [vmem:[#allocation3 + $0x38] sm:$0xff] %vm1542_vm3, %v1630_v38 }
 0x3bf   : > { %v1678_v39 = vpop.permute.xlu0 %1677  ;;  %v1723_v10 = vld [vmem:[#allocation3 + $0x80] sm:$0xff] }
 0x3c0   : > { %1688 = vst.msk [vmem:[#allocation3 + $0x40] sm:$0xff] %vm1542_vm3, %v1678_v39  ;;  %2090 = vmatprep.mubr.bf16.mxu0 %v1723_v10 }
 0x3c1   : > { %v1632_v41 = vpop.permute.xlu1 %1631  ;;  %2091 = vmatmul.mubr.bf16.gmra.mrb[28].mxu0 %v1722_v40  ;;  %v1709_v61 = vld [vmem:[#allocation3 + $0x10] sm:$0xff] }
 0x3c2   : > { %1641 = vst.msk [vmem:[#allocation3 + $0x60] sm:$0xff] %vm1542_vm3, %v1632_v41  ;;  %3117 = vmatprep.mubr.msk.bf16.mxu0 %vm477_vm0, %v1711_v42 }
 0x3c3   : > { %v1680_v43 = vpop.permute.xlu0 %1679  ;;  %v1710_v44 = vld [vmem:[#allocation3 + $0x18] sm:$0xff] }
 0x3c4   : > { %1689 = vst.msk [vmem:[#allocation3 + $0x68] sm:$0xff] %vm1542_vm3, %v1680_v43  ;;  %2131 = vmatprep.mubr.bf16.mxu1 %v1710_v44 }
 0x3c5   : > { %2132 = vmatmul.mubr.bf16.vlgmr.msra.gmra.mrb[16].mxu1 %v1709_v61  ;;  %v1634_v45 = vpop.permute.xlu1 %1633  ;;  %v1714_v48 = vld [vmem:[#allocation3 + $0x38] sm:$0xff] }
 0x3c6   : > { %1642 = vst.msk [vmem:[#allocation3 + $0x88] sm:$0xff] %vm1542_vm3, %v1634_v45 }
 0x3c7   : > { %v1682_v8 = vpop.permute.xlu0 %1681  ;;  %v1715_v46 = vld [vmem:[#allocation3 + $0x40] sm:$0xff] }
 0x3c8   : > { %1690 = vst.msk [vmem:[#allocation3 + $0x90] sm:$0xff] %vm1542_vm3, %v1682_v8  ;;  %2139 = vmatprep.mubr.bf16.mxu1 %v1715_v46 }
 0x3c9   : > { %3118 = vmatmul.mubr.msk.bf16.vlgmr.msra.gmra.mrb[32].mxu0 %vm477_vm0, %v1716_v47  ;;  %v1719_v51 = vld [vmem:[#allocation3 + $0x60] sm:$0xff] }
 0x3ca   : > { %3121 = vmatprep.mubr.msk.bf16.mxu0 %vm477_vm0, %v1721_v57  ;;  %3138 = vmatpush3.bf16.msra.mxu0 %v3275_v58 }
 0x3cb   : > { %v1720_v49 = vld [vmem:[#allocation3 + $0x68] sm:$0xff]  ;;  %3139 = vmatprep.subr.bf16.mxu0 %v3374_v0 }
 0x3cd   : > { %2140 = vmatmul.mubr.bf16.gmra.mrb[20].mxu1 %v1714_v48  ;;  %v1724_v53 = vld [vmem:[#allocation3 + $0x88] sm:$0xff] }
 0x3ce   : > { %2147 = vmatprep.mubr.bf16.mxu1 %v1720_v49  ;;  %3140 = vmatpush3.bf16.msra.mxu0 %v3277_v56 }
 0x3cf   : > { %v1725_v52 = vld [vmem:[#allocation3 + $0x90] sm:$0xff]  ;;  %3141 = vmatprep.subr.bf16.mxu0 %v3374_v0 }
 0x3d1   : > { %3122 = vmatmul.mubr.msk.bf16.gmra.mrb[36].mxu0 %vm477_vm0, %v1726_v50 }
 0x3d2   : > { %3145 = vmatprep.mubr.msk.bf16.mxu0 %vm3387_vm4, %v3374_v0 }
 0x3d5   : > { %2148 = vmatmul.mubr.bf16.gmra.mrb[24].mxu1 %v1719_v51 }
 0x3d6   : > { %2155 = vmatprep.mubr.bf16.mxu1 %v1725_v52 }
 0x3dd   : > { %2156 = vmatmul.mubr.bf16.gmra.mrb[28].mxu1 %v1724_v53 }
 0x3de   : > { %3133 = vmatprep.mubr.msk.bf16.mxu1 %vm3387_vm4, %v3374_v0 }
 0x465   : > { %v2996_v1 = vpop.f32.mrb[16].mxu0 }
 0x466   : > { %v2997_v59 = vpop.f32.mrb[17].mxu0 }
 0x467   : > { %v2998_v2 = vadd.f32 %v2997_v59, %v2996_v1  ;;  %v2999_v5 = vpop.f32.mrb[18].mxu0 }
 0x468   : > { %v3000_v7 = vpop.f32.mrb[19].mxu0 }
 0x469   : > { %v3001_v13 = vadd.f32 %v3000_v7, %v2999_v5  ;;  %v2069_v32 = vadd.f32 %v2998_v2, %v4092_v27 }
 0x46b   : > { %v2072_v33 = vadd.f32 %v3001_v13, %v4092_v27 }
 0x47c   : > { %v3002_v14 = vpop.f32.mrb[20].mxu0 }
 0x47d   : > { %v3003_v15 = vpop.f32.mrb[21].mxu0 }
 0x47e   : > { %v3004_v17 = vadd.f32 %v3003_v15, %v3002_v14  ;;  %v3005_v18 = vpop.f32.mrb[22].mxu0 }
 0x47f   : > { %v3006_v19 = vpop.f32.mrb[23].mxu0 }
 0x480   : > { %v3007_v20 = vadd.f32 %v3006_v19, %v3005_v18  ;;  %v2077_v41 = vadd.f32 %v3004_v17, %v4092_v27 }
 0x482   : > { %v2080_v8 = vadd.f32 %v3007_v20, %v4092_v27 }
 0x48c   : > { %v3008_v21 = vpop.f32.mrb[24].mxu0 }
 0x48d   : > { %v3009_v22 = vpop.f32.mrb[25].mxu0 }
 0x48e   : > { %v3010_v23 = vadd.f32 %v3009_v22, %v3008_v21  ;;  %v3011_v24 = vpop.f32.mrb[26].mxu0 }
 0x48f   : > { %v3012_v36 = vpop.f32.mrb[27].mxu0 }
 0x490   : > { %v3013_v60 = vadd.f32 %v3012_v36, %v3011_v24  ;;  %v2085_v1 = vadd.f32 %v3010_v23, %v4092_v27 }
 0x492   : > { %v2088_v14 = vadd.f32 %v3013_v60, %v4092_v27 }
 0x494   : > { %v3014_v25 = vpop.f32.mrb[28].mxu0 }
 0x495   : > { %v3015_v26 = vpop.f32.mrb[29].mxu0 }
 0x496   : > { %v3016_v12 = vadd.f32 %v3015_v26, %v3014_v25  ;;  %v3017_v3 = vpop.f32.mrb[30].mxu0 }
 0x497   : > { %v3018_v28 = vpop.f32.mrb[31].mxu0 }
 0x498   : > { %v4094_v29 = vadd.f32 %v3018_v28, %v3017_v3  ;;  %v3036_v30 = vpop.f32.mrb[16].mxu1  ;;  %v2093_v23 = vadd.f32 %v3016_v12, %v4092_v27 }
 0x499   : > { %v3037_v31 = vpop.f32.mrb[17].mxu1 }
 0x49a   : > { %v3038_v62 = vadd.f32 %v3037_v31, %v3036_v30  ;;  %v3039_v16 = vpop.f32.mrb[18].mxu1  ;;  %v2096_v60 = vadd.f32 %v4094_v29, %v4092_v27  ;;  %v3274_v27 = vld [vmem:[%s4263_s9] sm:$0xff]   ;;  %v3276_v29 = vld [vmem:[%s4263_s9 + $0x8] sm:$0xff]  }
 0x49b   : > { %v3040_v4 = vpop.f32.mrb[19].mxu1 }
 0x49c   : > { %v3041_v6 = vadd.f32 %v3040_v4, %v3039_v16  ;;  %v3119_v9 = vpop.f32.mrb[32].mxu0  ;;  %v2134_v11 = vadd.f32 %v3038_v62, %v2069_v32 }
 0x49d   : > { %v2198_v63 = vpop.f32.mrb[33].mxu0 }
 0x49e   : > { %v2199_v34 = vadd.f32 %v2198_v63, %v2134_v11  ;;  %v3120_v35 = vpop.f32.mrb[34].mxu0  ;;  %v2137_v37 = vadd.f32 %v3041_v6, %v2072_v33  ;;  %v3278_v11 = vld [vmem:[%s4263_s9 + $0x10] sm:$0xff]  }
 0x49f   : > { %v2201_v38 = vpop.f32.mrb[35].mxu0  ;;  %v3279_v63 = vld [vmem:[%s4263_s9 + $0x30] sm:$0xff]  }
 0x4a0   : > { %v2202_v39 = vadd.f32 %v2201_v38, %v2137_v37  ;;  %v3042_v10 = vpop.f32.mrb[20].mxu1  ;;  %v2229_v42 = vmax.f32 %v2199_v34, 0.0  ;;  %3142 = vmatpush3.bf16.msra.mxu0 %v3279_v63  ;;  %v3280_v34 = vld [vmem:[%s4263_s9 + $0x18] sm:$0xff]   ;;  %v3284_v37 = vld [vmem:[%s4265_s11 + $0x4] ss:$16 sps:$4 sm:$0xff]  }
 0x4a1   : > { %v3043_v40 = vpop.f32.mrb[21].mxu1  ;;  %3143 = vmatprep.subr.bf16.mxu0 %v3374_v0  ;;  %v3287_v38 = vld [vmem:[%s4265_s11 + $0xc] ss:$16 sps:$4 sm:$0xff]  }
 0x4a2   : > { %v2230_v43 = vmax.f32 %v2202_v39, 0.0  ;;  %v3044_v44 = vadd.f32 %v3043_v40, %v3042_v10  ;;  %v3045_v61 = vpop.f32.mrb[22].mxu1  ;;  %v2246_v39 = vpop.permute.xlu0 %2245 }
 0x4a3   : > { %v3046_v45 = vpop.f32.mrb[23].mxu1 }
 0x4a4   : > { %v2238_v46 = vpack.c.bf16 %v2230_v43, %v2229_v42  ;;  %v2142_v47 = vadd.f32 %v3044_v44, %v2077_v41  ;;  %v3047_v57 = vadd.f32 %v3046_v45, %v3045_v61  ;;  %v3123_v48 = vpop.f32.mrb[36].mxu0  ;;  %v3285_v44 = vld [vmem:[%s4265_s11 + $0x8] ss:$16 sps:$4 sm:$0xff]   ;;  %v3293_v45 = vld [vmem:[%s4265_s11 + $0x2c] ss:$16 sps:$4 sm:$0xff]  }
 0x4a5   : > { %v2214_v49 = vpop.f32.mrb[37].mxu0 }
 0x4a6   : > { %v2207_v50 = vadd.f32 %v3119_v9, %v2142_v47  ;;  %v2145_v51 = vadd.f32 %v3047_v57, %v2080_v8  ;;  %v3124_v52 = vpop.f32.mrb[38].mxu0  ;;  %3126 = vmatpush3.bf16.xpose.msra.mxu1 %v2238_v46  ;;  %v2237_v9 = vld [vmem:[%s4261_s7] sm:$0x1]  ;;  %v3290_v47 = vld [vmem:[%s4265_s11 + $0x24] ss:$16 sps:$4 sm:$0xff]  }
 0x4a7   : > { %v2217_v53 = vpop.f32.mrb[39].mxu0  ;;  %3127 = vmatprep.subr.bf16.mxu1 %v3374_v0  ;;  %v3282_v8 = vld [vmem:[%s4265_s11] ss:$16 sps:$4 sm:$0xff]   ;;  %v3291_v57 = vld [vmem:[%s4265_s11 + $0x28] ss:$16 sps:$4 sm:$0xff]  }
 0x4a8   : > { %v2210_v54 = vadd.f32 %v3120_v35, %v2145_v51  ;;  %v3048_v58 = vpop.f32.mrb[24].mxu1  ;;  %v2231_v59 = vmax.f32 %v2207_v50, 0.0  ;;  %v3281_v35 = vld [vmem:[%s4263_s9 + $0x38] sm:$0xff]   ;;  %v3294_v51 = vld [vmem:[%s4265_s11 + $0x40] ss:$16 sps:$4 sm:$0xff]  }
 0x4a9   : > { %v3049_v56 = vpop.f32.mrb[25].mxu1  ;;  %3144 = vmatpush3.bf16.msra.mxu0 %v3281_v35  ;;  %v3299_v50 = vld [vmem:[%s4265_s11 + $0x4c] ss:$16 sps:$4 sm:$0xff]  }
 0x4aa   : > { %v2232_v2 = vmax.f32 %v2210_v54, 0.0  ;;  %v3050_v5 = vadd.f32 %v3049_v56, %v3048_v58  ;;  %v3051_v7 = vpop.f32.mrb[26].mxu1  ;;  %2567 = vmatprep.subr.bf16.mxu0 %v3284_v37  ;;  %v3300_v54 = vld [vmem:[%s4265_s11 + $0x60] ss:$16 sps:$4 sm:$0xff]   ;;  %v3303_v58 = vld [vmem:[%s4265_s11 + $0x68] ss:$16 sps:$4 sm:$0xff]  }
 0x4ab   : > { %v3052_v13 = vpop.f32.mrb[27].mxu1 }
 0x4ac   : > { %v2239_v15 = vpack.c.bf16 %v2232_v2, %v2231_v59  ;;  %v2150_v17 = vadd.f32 %v3050_v5, %v2085_v1  ;;  %v3053_v18 = vadd.f32 %v3052_v13, %v3051_v7  ;;  %v2442_v2 = vld [vmem:[%s4264_s10] sm:$0x1] }
 0x4ae   : > { %v2215_v19 = vadd.f32 %v2214_v49, %v2150_v17  ;;  %v2153_v20 = vadd.f32 %v3053_v18, %v2088_v14  ;;  %3128 = vmatpush3.bf16.xpose.msra.mxu1 %v2239_v15  ;;  %v3296_v49 = vld [vmem:[%s4265_s11 + $0x44] ss:$16 sps:$4 sm:$0xff]  }
 0x4af   : > { %3129 = vmatprep.subr.bf16.mxu1 %v3374_v0 }
 0x4b0   : > { %v2218_v21 = vadd.f32 %v2217_v53, %v2153_v20  ;;  %v3054_v22 = vpop.f32.mrb[28].mxu1  ;;  %v2233_v36 = vmax.f32 %v2215_v19, 0.0  ;;  %v3305_v53 = vld [vmem:[%s4265_s11 + $0x6c] ss:$16 sps:$4 sm:$0xff]  }
 0x4b1   : > { %v3055_v24 = vpop.f32.mrb[29].mxu1 }
 0x4b2   : > { %v2234_v25 = vmax.f32 %v2218_v21, 0.0  ;;  %v3056_v26 = vadd.f32 %v3055_v24, %v3054_v22  ;;  %v3057_v3 = vpop.f32.mrb[30].mxu1  ;;  %v2544_v21 = vlaneseq }
 0x4b3   : > { %v3058_v28 = vpop.f32.mrb[31].mxu1 }
 0x4b4   : > { %v2240_v30 = vpack.c.bf16 %v2234_v25, %v2233_v36  ;;  %v2158_v31 = vadd.f32 %v3056_v26, %v2093_v23  ;;  %v3059_v32 = vadd.f32 %v3058_v28, %v3057_v3  ;;  %v2545_v22 = vshrl.u32 %v2544_v21, 7  ;;  %v2462_v36 = vld [vmem:[%s4266_s12] sm:$0xf] }
 0x4b5   : > { %v3389_v26 = vmov 1966171168  }
 0x4b6   : > { %v2223_v62 = vadd.f32 %v3123_v48, %v2158_v31  ;;  %v2161_v16 = vadd.f32 %v3059_v32, %v2096_v60  ;;  %3130 = vmatpush3.bf16.xpose.msra.mxu1 %v2240_v30  ;;  %v3288_v48 = vld [vmem:[%s4265_s11 + $0x20] ss:$16 sps:$4 sm:$0xff]   ;;  %v2546_v24 = vsub.s32 0, %v2545_v22  ;;  %v2554_v23 = vsub.s32 2, %v2545_v22 }
 0x4b7   : > { %3131 = vmatprep.subr.bf16.mxu1 %v3374_v0  ;;  %v2550_v25 = vsub.s32 1, %v2545_v22  ;;  %v2656_v3 = vunpack.c.l.s4 %v3389_v26  ;;  %v2558_v28 = vsub.s32 3, %v2545_v22 }
 0x4b8   : > { %v2226_v4 = vadd.f32 %v3124_v52, %v2161_v16  ;;  %v2235_v33 = vmax.f32 %v2223_v62, 0.0  ;;  %v3297_v52 = vld [vmem:[%s4265_s11 + $0x48] ss:$16 sps:$4 sm:$0xff]   ;;  %v2547_v60 = vrot.slane %v2462_v36, %v2546_v24  ;;  %v2555_v30 = vrot.slane %v2462_v36, %v2554_v23 }
 0x4b9   : > { %v2551_v31 = vrot.slane %v2462_v36, %v2550_v25  ;;  %v2657_v32 = vunpack.c.0.s8 %v2656_v3  ;;  %v2559_v62 = vrot.slane %v2462_v36, %v2558_v28 }
 0x4ba   : > { %v2236_v6 = vmax.f32 %v2226_v4, 0.0 }
 0x4bc   : > { %v2241_v12 = vpack.c.bf16 %v2236_v6, %v2235_v33 }
 0x4be   : > { %3132 = vmatpush3.bf16.xpose.msra.mxu1 %v2241_v12 }
 0x4bf   : > { %3149 = vmatprep.subr.bf16.mxu1 %v3374_v0 }
 0x4c5   : > { %3134 = vmatmul.mubr.bf16.vlgmr.msra.gmra.mrb[32].mxu1 %v2237_v9 }
 0x4c6   : > { %3150 = vmatpush3.bf16.msra.mxu1 %v3274_v27  ;;  %3157 = vmatprep.mubr.msk.bf16.mxu1 %vm3387_vm4, %v3374_v0 }
 0x4c7   : > { %3151 = vmatprep.subr.bf16.mxu1 %v3374_v0 }
 0x4ca   : > { %3152 = vmatpush3.bf16.msra.mxu1 %v3276_v29  ;;  %v2660_v29 = vsub.s32 %v2657_v32, %v2545_v22 }
 0x4cb   : > { %3153 = vmatprep.subr.bf16.mxu1 %v3374_v0 }
 0x4ce   : > { %3154 = vmatpush3.bf16.msra.mxu1 %v3278_v11 }
 0x4cf   : > { %3155 = vmatprep.subr.bf16.mxu1 %v3374_v0 }
 0x4d2   : > { %3156 = vmatpush3.bf16.msra.mxu1 %v3280_v34 }
 0x4d3   : > { %2608 = vmatprep.subr.bf16.mxu1 %v3287_v38 }
 0x598   : > { %v2282_v10 = vpop.f32.mrb[32].mxu1 }
 0x599   : > { %v2283_v40 = vadd.f32 %v2282_v10, %v2246_v39  ;;  %v3135_v0 = vpop.f32.mrb[33].mxu1 }
 0x59a   : > { %v2285_v41 = vpop.f32.mrb[34].mxu1 }
 0x59b   : > { %v2288_v42 = vmax.f32 %v2283_v40, 0.0  ;;  %v3136_v43 = vpop.f32.mrb[35].mxu1 }
 0x59d   : > { %v2289_v61 = vpack.c.bf16 %v2288_v42, %v2288_v42 }
 0x59f   : > { %v2307_v46 = vshrl.u32 %v2289_v61, 16  ;;  %3158 = vmatmul.mubr.msk.bf16.vlgmr.msra.gmra.mrb[36].mxu1 %vm477_vm0, %v2289_v61 }
 0x5a0   : > { %2609 = vmatpush1.bf16.msra.mxu1 %v3285_v44  ;;  %2640 = vmatprep.mubr.bf16.mxu1 %v3388_v55 }
 0x5a1   : > { %3146 = vmatmul.mubr.msk.bf16.vlgmr.msra.gmra.mrb[40].mxu0 %vm477_vm0, %v2307_v46  ;;  %2610 = vmatprep.subr.bf16.mxu1 %v3293_v45 }
 0x5a2   : > { %2568 = vmatpush1.bf16.msra.mxu0 %v3282_v8  ;;  %2599 = vmatprep.mubr.bf16.mxu0 %v3388_v55  ;;  %v3302_v55 = vld [vmem:[%s4265_s11 + $0x64] ss:$16 sps:$4 sm:$0xff]  }
 0x5a3   : > { %2569 = vmatprep.subr.bf16.mxu0 %v3290_v47 }
 0x5a4   : > { %2611 = vmatpush1.bf16.msra.mxu1 %v3291_v57 }
 0x5a5   : > { %2612 = vmatprep.subr.bf16.mxu1 %v3299_v50 }
 0x5a6   : > { %2570 = vmatpush1.bf16.msra.mxu0 %v3288_v48 }
 0x5a7   : > { %2571 = vmatprep.subr.bf16.mxu0 %v3296_v49 }
 0x5a8   : > { %2613 = vmatpush1.bf16.msra.mxu1 %v3297_v52 }
 0x5a9   : > { %2614 = vmatprep.subr.bf16.mxu1 %v3305_v53 }
 0x5aa   : > { %2572 = vmatpush1.bf16.msra.mxu0 %v3294_v51 }
 0x5ab   : > { %2573 = vmatprep.subr.bf16.mxu0 %v3302_v55 }
 0x5ac   : > { %2615 = vmatpush1.bf16.msra.mxu1 %v3303_v58 }
 0x5ae   : > { %2574 = vmatpush1.bf16.msra.mxu0 %v3300_v54 }
 0x672   : > { %v2436_v56 = vpop.f32.mrb[36].mxu1 }
 0x673   : > { %v3159_v1 = vpop.f32.mrb[37].mxu1 }
 0x674   : > { %v2370_v59 = vpop.f32.mrb[40].mxu0  ;;  %v2439_v5 = vpop.f32.mrb[38].mxu1 }
 0x675   : > { %v2437_v7 = vadd.f32 %v2436_v56, %v2370_v59  ;;  %v3147_v13 = vpop.f32.mrb[41].mxu0  ;;  %v3160_v14 = vpop.f32.mrb[39].mxu1 }
 0x676   : > { %v2373_v15 = vpop.f32.mrb[42].mxu0 }
 0x677   : > { %v2443_v17 = vadd.f32 %v2442_v2, %v2437_v7  ;;  %v3148_v18 = vpop.f32.mrb[43].mxu0 }
 0x679   : > { %v2444_v19 = vmax.f32 %v2443_v17, 0.0 }
 0x67b   : > { %v2445_v20 = vpack.c.bf16 %v2444_v19, %v2444_v19 }
 0x67d   : > { %2921 = vmatmul.mubr.msk.bf16.vlgmr.msra.gmra.mrb[44].mxu0 %vm477_vm0, %v2445_v20  ;;  %2922 = vmatmul.mubr.msk.bf16.vlgmr.msra.gmra.mrb[40].mxu1 %vm477_vm0, %v2445_v20  ;;  %vm2680_vm0 = vcmp.lt.s32.totalorder %v2544_v21, 512 }
 0x750   : > { %v2601_v16 = vpop.f32.mrb[44].mxu0  ;;  %v2642_v4 = vpop.f32.mrb[40].mxu1 }
 0x751   : > { %v2602_v33 = vadd.f32 %v2601_v16, %v2547_v60  ;;  %v2643_v6 = vadd.f32 %v2642_v4, %v2555_v30  ;;  %v2603_v12 = vpop.f32.mrb[45].mxu0  ;;  %v2644_v9 = vpop.f32.mrb[41].mxu1 }
 0x752   : > { %v2604_v27 = vadd.f32 %v2603_v12, %v2551_v31  ;;  %v2645_v11 = vadd.f32 %v2644_v9, %v2559_v62  ;;  %v2605_v63 = vpop.f32.mrb[46].mxu0  ;;  %v2646_v34 = vpop.f32.mrb[42].mxu1 }
 0x753   : > { %v2606_v35 = vpop.f32.mrb[47].mxu0  ;;  %2683 = vrot.lane.b32.xlu1 %v2602_v33, %s4297_s1  ;;  %v2647_v37 = vpop.f32.mrb[43].mxu1  ;;  %2693 = vrot.lane.b32.xlu0 %v2643_v6, %s4297_s1 }
 0x754   : > { %v2653_v38 = vcombine.low %v2602_v33, %v2604_v27  ;;  %v2654_v39 = vcombine.low %v2643_v6, %v2645_v11 }
 0x756   : > { %v2661_v10 = vrot.slane %v2653_v38, %v2660_v29  ;;  %v2668_v40 = vrot.slane %v2654_v39, %v2660_v29 }
 0x757   : > { %2688 = vrot.lane.b32.xlu1 %v2604_v27, %s4297_s1 }
 0x758   : > { %v2669_v0 = vcombine.low %v2661_v10, %v2668_v40 }
 0x75a   : > { %v2676_v41 = vrot.slane %v2669_v0, %v2660_v29 }
 0x75b   : > { %2698 = vrot.lane.b32.xlu1 %v2645_v11, %s4297_s1  ;;  %s2923_s1 = sshll.u32 %s3487_s17, 4  ;;  %s3390_s17 = smov [#allocation4]  }
 0x75c   : > { %2682 = vst.msk [vmem:[%s475_s15] sm:$0xf] %vm2680_vm0, %v2676_v41  ;;  %s4211_s21 = scalar_lea.hbm %s4267_s13, %s2923_s1  ;;  %s3314_s28 = sshll.u32 %s3390_s17, 4  ;;  %s3315_s28 = int_to_ptr.vmem [resolvable:$false] %s3314_s28 }
 0x75d   : > { %s3316_s20 = scalar_lea.vmem %s3315_s28, 32  ;;  %p3317_p0 = scmp.lt.s32.totalorder %s4213_s26, %s3315_s28 }
 0x75e   : > { %p3318_p1 = scmp.lt.s32.totalorder %s3316_s20, %s3310_s27 }
 0x760   : > { %p3319_p2 = por %p3318_p1, %p3317_p0 }
 0x762   : > { %p3320_p3 = pnand %p3319_p2, %p3313_p13 }
 0x7c5   : > { %v2684_v42 = vpop.permute.xlu1 %2683  ;;  %v2694_v46 = vpop.permute.xlu0 %2693 }
 0x7c6   : > { %v2686_v43 = vadd.f32 %v2684_v42, %v2602_v33 }
 0x7c8   : > { %v2687_v44 = vadd.f32 %v2686_v43, %v2604_v27 }
 0x7c9   : > { %v2689_v61 = vpop.permute.xlu1 %2688 }
 0x7ca   : > { %v2691_v45 = vadd.f32 %v2689_v61, %v2687_v44 }
 0x7cc   : > { %v2692_v8 = vadd.f32 %v2691_v45, %v2643_v6 }
 0x7cd   : > { %v2699_v48 = vpop.permute.xlu1 %2698 }
 0x7ce   : > { %v2696_v47 = vadd.f32 %v2694_v46, %v2692_v8 }
 0x7d0   : > { %v2697_v57 = vadd.f32 %v2696_v47, %v2645_v11 }
 0x7d2   : > { %v2701_v49 = vadd.f32 %v2699_v48, %v2697_v57 }
 0x7d4   : > { %v2702_v50 = vmul.f32 0.125, %v2701_v49 }
 0x7d6   : > { %v2704_v51 = vsel %vm2703_vm5, %v2702_v50, -inf }
 0x7d7   : > { %2705 = vmax.xlane.f32.xlu0 %v2704_v51 }
 0x864   : > { %v2706_v52 = vpop.xlane.xlu0 %2705 }
 0x865   : > { %v2707_v55 = vsub.f32 %v2702_v50, %v2706_v52 }
 0x867   : > { %v2708_v53 = vmul.f32 1.442695, %v2707_v55 }
 0x869   : > { %3306 = vpow2.f32 %v2708_v53 }
 0x873   : > { %v3307_v54 = vpop.eup %3306 }
 0x874   : > { %v2710_v58 = vsel %vm2703_vm5, %v3307_v54, 0.0 }
 0x875   : > { %2711 = vadd.xlane.f32.xlu1 %v2710_v58 }
 0x902   : > { %v2712_v56 = vpop.xlane.xlu1 %2711 }
 0x903   : > { %3308 = vlog2.f32 %v2712_v56 }
 0x90d   : > { %v3309_v1 = vpop.eup %3308 }
 0x90e   : > { %v2714_v59 = vmul.f32 0.6931472, %v3309_v1 }
 0x910   : > { %v2715_v2 = vsub.f32 %v2707_v55, %v2714_v59 }
 0x912   : > { %2716 = vst.msk [vmem:[%s460_s22] sm:$0x1] %vm2703_vm5, %v2715_v2 }
 0x913   : > { %3323 = shalt.err (!%p3320_p3)
}
 0x914   : > { %s3324_s15 = scalar_lea.hbm %s4211_s21, 16  ;;  %s3328_s22 = scalar_lea.hbm %s4267_s13, 32 }
 0x915   : > { %p3325_p4 = scmp.ne.s32.totalorder %s4211_s21, %s3324_s15  ;;  %p3329_p9 = scmp.lt.u32.totalorder %s4211_s21, %s4267_s13 }
 0x916   : > { %p3330_p10 = scmp.lt.u32.totalorder %s3328_s22, %s3324_s15  ;;  %p3332_p12 = scmp.lt.u32.totalorder %s3324_s15, %s4211_s21 }
 0x917   : > { %p3326_p7 = pnand %p3325_p4, %p3504_p5 }
 0x918   : > { %p3331_p11 = por %p3330_p10, %p3329_p9 }
 0x919   : > { %p3327_p8 = pneg %p3326_p7 }
 0x91a   : > { %p3333_p13 = por %p3332_p12, %p3331_p11 }
 0x91c   : > { %p3334_p0 = pnand %p3333_p13, %p3327_p8 }
 0x91e   : > { %3337 = shalt.err (!%p3334_p0)
}
 0x91f   : > { %3161 = dma.vmem_to_hbm [thread:$0]  (%p3504_p5), %s4213_s26, 16, %s4211_s21, %s2718_s0  }
 0x920 PF: > { %p3167_p1 = scmp.ge.s32.totalorder %s3372_s16, 2  ;;  %s2749_s27 = sand.u32 1, %s3360_s29  }
 0x921   : > { %s2750_s17 = scalar_lea.sflag [#allocation5], %s2749_s27 }
 0x922   : > { %p3164_p2 = pnand %p3167_p1, %p3508_p6 }
 0x924   : > { %3355 = dma.done.wait (!%p3164_p2), %s2750_s17, 16  }
 0x925   : > { %3357 = vsyncadd (!%p3164_p2), %s2750_s17, 4294967280  ;;  %s4298_s28 = sld [smem:[#allocation7_spill]]  ;;  %s4299_s15 = sld [smem:[#allocation8_spill]] }
 0x926   : > { %p25_p3 = scmp.ge.s32.totalorder %s3491_s19, 4   ;;  %s4300_s29 = smov %s3364_s30 }
 0x927   : > { %s4302_s16 = smov %s3491_s19 }
 0x928   :  { %27 = sbr.rel (!%p25_p3) target bundleno = 7 (0x7), region = 121 }
 0x92b   : > { %s4301_s30 = smov %s4298_s28 }
 0x92f   :  { %2761 = vsyncpa [#allocation5], 1 }
 0x930   :  { %2763 = vsyncpa [#allocation5 + $0x1], 1 }

</bundles_post_ra>
